<compile_context>
chip_gen: v7x
topology: tpu7x:2x2x1
jax: 0.10.0
libtpu: 0.0.40
codegen_flags: <defaults>
</compile_context>

<pallas_src>
import functools

import jax
import jax.numpy as jnp
from jax.experimental import pallas as pl
from jax.experimental.pallas import tpu as pltpu


def _round_up(n, m):
    return pl.cdiv(n, m) * m


def _vmem_limit_bytes():
    # Per-generation VMEM budget with ~15% headroom for compiler-internal
    # scratch / semaphores.  v5e/v6e (128 MiB) -> ~108 MiB, v7x (64 MiB) -> ~54 MiB.
    try:
        cap = pltpu.get_tpu_info().vmem_capacity_bytes
    except Exception:  # conservative fallback (v7x physical size)
        cap = 64 * 1024 * 1024
    return int(cap * 0.85)


_VMEM_LIMIT_BYTES = _vmem_limit_bytes()


def mlp_kernel(x_ref, w1_ref, b1_ref, w2_ref, b2_ref, o_ref):
    # x_ref: (TILE_B, d_in) bf16    w1_ref: (d_in, d_hid) bf16   b1_ref: (1, d_hid) f32
    # w2_ref: (d_hid, d_out) bf16   b2_ref: (1, d_out) f32       o_ref: (TILE_B, d_out) bf16
    x = x_ref[...]
    # First GEMM on the MXU, f32 accumulation; bias + ReLU in f32 on the VPU
    # (f32 path is safe on v5e which has no bf16 VALU).
    h = jnp.dot(x, w1_ref[...], preferred_element_type=jnp.float32)
    h = jnp.maximum(h + b1_ref[...], 0.0)
    # Second GEMM: cast activation back to bf16 for the MXU, accumulate in f32.
    y = jnp.dot(h.astype(w2_ref.dtype), w2_ref[...],
                preferred_element_type=jnp.float32)
    o_ref[...] = (y + b2_ref[...]).astype(o_ref.dtype)


@functools.partial(jax.jit, static_argnames=("tile_b",))
def source_forward(x, w1, b1, w2, b2, *, tile_b=512):
    """Equivalent of Source(model).forward(x) with model = Linear->ReLU->Linear."""
    B, d_in = x.shape
    d_hid = w1.shape[1]
    d_out = w2.shape[1]

    # Batch tile: multiple of 16 (keeps the (8,128) block constraint happy for
    # bf16), clamped for tiny batches.  No padding: cdiv grid + masked stores
    # handle a ragged last block, avoiding the pad/slice HBM round-trips.
    tile_b = min(tile_b, _round_up(B, 16))
    grid_b = pl.cdiv(B, tile_b)

    # TODO(synk): if d_in*d_hid*2 + d_hid*d_out*2 bytes ever exceeds ~half the
    # VMEM budget, add a d_hid/d_out grid axis (f32 accumulator + pl.when
    # init/finalize) instead of keeping both weight matrices fully resident.

    itemsize = x.dtype.itemsize
    cost = pl.CostEstimate(
        flops=2 * B * d_hid * (d_in + d_out),
        transcendentals=0,
        bytes_accessed=(B * d_in * itemsize
                        + w1.size * w1.dtype.itemsize + b1.size * b1.dtype.itemsize
                        + w2.size * w2.dtype.itemsize + b2.size * b2.dtype.itemsize
                        + B * d_out * itemsize),
    )

    # Only split the batch axis across v7x cores when there are enough grid
    # steps per core; otherwise a megacore split just duplicates the weight DMA.
    batch_semantics = "parallel" if grid_b >= 4 else "arbitrary"

    out = pl.pallas_call(
        mlp_kernel,
        out_shape=jax.ShapeDtypeStruct((B, d_out), x.dtype),
        grid_spec=pltpu.PrefetchScalarGridSpec(
            num_scalar_prefetch=0,
            grid=(grid_b,),
            in_specs=[
                # Activation tile: streamed + double-buffered across the grid.
                pl.BlockSpec((tile_b, d_in), lambda i: (i, 0)),
                # Weights / biases: constant index_map -> VMEM-resident; single
                # buffer since the block never changes.
                pl.BlockSpec((d_in, d_hid), lambda i: (0, 0),
                             pipeline_mode=pl.Buffered(1)),
                pl.BlockSpec((1, d_hid), lambda i: (0, 0),
                             pipeline_mode=pl.Buffered(1)),
                pl.BlockSpec((d_hid, d_out), lambda i: (0, 0),
                             pipeline_mode=pl.Buffered(1)),
                pl.BlockSpec((1, d_out), lambda i: (0, 0),
                             pipeline_mode=pl.Buffered(1)),
            ],
            out_specs=pl.BlockSpec((tile_b, d_out), lambda i: (i, 0)),
        ),
        compiler_params=pltpu.CompilerParams(
            dimension_semantics=(batch_semantics,),
            vmem_limit_bytes=_VMEM_LIMIT_BYTES,
        ),
        cost_estimate=cost,
    )(x, w1, b1, w2, b2)

    return out


def init_params(key, d_in, d_hid, d_out):
    k1, k2, k3, k4 = jax.random.split(key, 4)
    # Deterministic PyTorch-Linear-like uniform init (synthetic weights).
    # Weights in bf16 (MXU operands), biases in f32 (added in the f32 accumulator).
    w1 = (jax.random.uniform(k1, (d_in, d_hid), jnp.float32, -1.0, 1.0)
          / jnp.sqrt(d_in)).astype(jnp.bfloat16)
    b1 = jax.random.uniform(k2, (1, d_hid), jnp.float32, -1.0, 1.0) / jnp.sqrt(d_in)
    w2 = (jax.random.uniform(k3, (d_hid, d_out), jnp.float32, -1.0, 1.0)
          / jnp.sqrt(d_hid)).astype(jnp.bfloat16)
    b2 = jax.random.uniform(k4, (1, d_out), jnp.float32, -1.0, 1.0) / jnp.sqrt(d_hid)
    return w1, b1, w2, b2


if __name__ == "__main__":
    key = jax.random.PRNGKey(0)
    kx, kp = jax.random.split(key)

    # Lane-dense feature dims (multiples of 128); batch deliberately NOT a
    # multiple of tile_b=512 so the pad-free ragged-last-block path is exercised
    # (grid of 2 steps, second block masked on store).
    batch, d_in, d_hid, d_out = 640, 128, 256, 128
    x = jax.random.normal(kx, (batch, d_in), jnp.float32).astype(jnp.bfloat16)
    w1, b1, w2, b2 = init_params(kp, d_in, d_hid, d_out)

    out = source_forward(x, w1, b1, w2, b2)
    jax.block_until_ready(out)

    # Reference with identical precision policy (bf16 operands, f32 accumulate).
    h_ref = jnp.maximum(
        jnp.dot(x, w1, preferred_element_type=jnp.float32) + b1, 0.0)
    ref = (jnp.dot(h_ref.astype(jnp.bfloat16), w2,
                   preferred_element_type=jnp.float32) + b2).astype(x.dtype)

    assert out.shape == (batch, d_out)
    assert jnp.allclose(out.astype(jnp.float32), ref.astype(jnp.float32),
                        atol=2e-2, rtol=2e-2)

    print("KERNEL_OK")
</pallas_src>

<mosaic_0001>
module attributes {stable_mosaic.version = 11 : i64} {
  func.func @mlp_kernel(%arg0: i32, %arg1: memref<512x128xbf16, #tpu.memory_space<vmem>>, %arg2: memref<128x256xbf16, #tpu.memory_space<vmem>>, %arg3: memref<1x256xf32, #tpu.memory_space<vmem>>, %arg4: memref<256x128xbf16, #tpu.memory_space<vmem>>, %arg5: memref<1x128xf32, #tpu.memory_space<vmem>>, %arg6: memref<512x128xbf16, #tpu.memory_space<vmem>>) attributes {dimension_semantics = [#tpu.dimension_semantics<arbitrary>], iteration_bounds = array<i64: 2>, scalar_prefetch = 0 : i64, scratch_operands = 0 : i64, tpu.core_type = #tpu.core_type<tc>, window_params = [{transform_indices = @transform_0, window_bounds = array<i64: 512, 128>}, {pipeline_mode = #tpu.pipeline_mode<synchronous>, transform_indices = @transform_1, window_bounds = array<i64: 128, 256>}, {pipeline_mode = #tpu.pipeline_mode<synchronous>, transform_indices = @transform_2, window_bounds = array<i64: 1, 256>}, {pipeline_mode = #tpu.pipeline_mode<synchronous>, transform_indices = @transform_3, window_bounds = array<i64: 256, 128>}, {pipeline_mode = #tpu.pipeline_mode<synchronous>, transform_indices = @transform_4, window_bounds = array<i64: 1, 128>}, {transform_indices = @transform_5, window_bounds = array<i64: 512, 128>}]} {
    %c0 = arith.constant 0 : index
    %c0_0 = arith.constant 0 : index
    %0 = vector.load %arg1[%c0, %c0_0] : memref<512x128xbf16, #tpu.memory_space<vmem>>, vector<512x128xbf16>
    %c0_1 = arith.constant 0 : index
    %c0_2 = arith.constant 0 : index
    %1 = vector.load %arg2[%c0_1, %c0_2] : memref<128x256xbf16, #tpu.memory_space<vmem>>, vector<128x256xbf16>
    %cst = arith.constant dense<0.000000e+00> : vector<512x256xf32>
    %2 = tpu.matmul %0, %1, %cst {dimension_numbers = #tpu.dot_dimension_numbers<[1], [0], [0], [1], [0, 0, 1, 1], [], []>} : vector<512x128xbf16>, vector<128x256xbf16>, vector<512x256xf32> -> vector<512x256xf32>
    %c0_3 = arith.constant 0 : index
    %c0_4 = arith.constant 0 : index
    %3 = vector.load %arg3[%c0_3, %c0_4] : memref<1x256xf32, #tpu.memory_space<vmem>>, vector<1x256xf32>
    %4 = vector.broadcast %3 : vector<1x256xf32> to vector<512x256xf32>
    %5 = arith.addf %2, %4 : vector<512x256xf32>
    %cst_5 = arith.constant 0.000000e+00 : f32
    %6 = vector.broadcast %cst_5 : f32 to vector<512x256xf32>
    %7 = arith.maximumf %5, %6 : vector<512x256xf32>
    %8 = arith.truncf %7 : vector<512x256xf32> to vector<512x256xbf16>
    %c0_6 = arith.constant 0 : index
    %c0_7 = arith.constant 0 : index
    %9 = vector.load %arg4[%c0_6, %c0_7] : memref<256x128xbf16, #tpu.memory_space<vmem>>, vector<256x128xbf16>
    %cst_8 = arith.constant dense<0.000000e+00> : vector<512x128xf32>
    %10 = tpu.matmul %8, %9, %cst_8 {dimension_numbers = #tpu.dot_dimension_numbers<[1], [0], [0], [1], [0, 0, 1, 1], [], []>} : vector<512x256xbf16>, vector<256x128xbf16>, vector<512x128xf32> -> vector<512x128xf32>
    %c0_9 = arith.constant 0 : index
    %c0_10 = arith.constant 0 : index
    %11 = vector.load %arg5[%c0_9, %c0_10] : memref<1x128xf32, #tpu.memory_space<vmem>>, vector<1x128xf32>
    %12 = vector.broadcast %11 : vector<1x128xf32> to vector<512x128xf32>
    %13 = arith.addf %10, %12 : vector<512x128xf32>
    %14 = arith.truncf %13 : vector<512x128xf32> to vector<512x128xbf16>
    %c0_11 = arith.constant 0 : index
    %c0_12 = arith.constant 0 : index
    %15 = vector.load %arg6[%c0_11, %c0_12] : memref<512x128xbf16, #tpu.memory_space<vmem>>, vector<512x128xbf16>
    tpu.vector_store %arg6[%c0_11, %c0_12], %14 {strides = array<i32>} : memref<512x128xbf16, #tpu.memory_space<vmem>>, vector<512x128xbf16>,
    return
  }
  func.func @transform_0(%arg0: i32) -> (i32, i32) {
    %c0_i32 = arith.constant 0 : i32
    %c0_i32_0 = arith.constant 0 : i32
    return %arg0, %c0_i32 : i32, i32
  }
  func.func @transform_1(%arg0: i32) -> (i32, i32) {
    %c0_i32 = arith.constant 0 : i32
    %c0_i32_0 = arith.constant 0 : i32
    %c0_i32_1 = arith.constant 0 : i32
    return %c0_i32, %c0_i32_0 : i32, i32
  }
  func.func @transform_2(%arg0: i32) -> (i32, i32) {
    %c0_i32 = arith.constant 0 : i32
    %c0_i32_0 = arith.constant 0 : i32
    %c0_i32_1 = arith.constant 0 : i32
    return %c0_i32, %c0_i32_0 : i32, i32
  }
  func.func @transform_3(%arg0: i32) -> (i32, i32) {
    %c0_i32 = arith.constant 0 : i32
    %c0_i32_0 = arith.constant 0 : i32
    %c0_i32_1 = arith.constant 0 : i32
    return %c0_i32, %c0_i32_0 : i32, i32
  }
  func.func @transform_4(%arg0: i32) -> (i32, i32) {
    %c0_i32 = arith.constant 0 : i32
    %c0_i32_0 = arith.constant 0 : i32
    %c0_i32_1 = arith.constant 0 : i32
    return %c0_i32, %c0_i32_0 : i32, i32
  }
  func.func @transform_5(%arg0: i32) -> (i32, i32) {
    %c0_i32 = arith.constant 0 : i32
    %c0_i32_0 = arith.constant 0 : i32
    return %arg0, %c0_i32 : i32, i32
  }
}

</mosaic_0001>

<bundles_post_ra>
// kernel: source_forward.1
= control target key start
LH: loop header
LB: loop body
LE: loop exit
PB: predicated region body
PF: predicated region fallthrough
CT: control target
= control target key end

     0   :  { %10 = vsyncpa [#allocation3], 0  ;;  %s3436_s0 = inlined_call_operand.hbm [shape: bf16[640,128], index: 0, kind: input, shape index: {}]   ;;  %s3437_s1 = inlined_call_operand.hbm [shape: bf16[128,256], index: 1, kind: input, shape index: {}]   ;;  %s3438_s2 = inlined_call_operand.vmem [shape: f32[1,256], index: 2, kind: input, shape index: {}]   ;;  %s3439_s3 = inlined_call_operand.hbm [shape: bf16[256,128], index: 3, kind: input, shape index: {}]   ;;  %s3440_s4 = inlined_call_operand.vmem [shape: f32[1,128], index: 4, kind: input, shape index: {}]   ;;  %s3441_s5 = inlined_call_operand.hbm [shape: bf16[640,128], index: 5, kind: output, shape index: {}]  }
   0x1   :  { %12 = vsyncpa [#allocation3 + $0x1], 0 }
   0x2   :  { %13 = vsyncpa [#allocation6], 0 }
   0x3   :  { %14 = vsyncpa [#allocation4], 0 }
   0x4   :  { %16 = vsyncpa [#allocation4 + $0x1], 0  ;;  %s2838_s18 = smov 0   ;;  %s2840_s19 = smov 0  }
   0x5   :  { %s2842_s20 = smov 0   ;;  %s2844_s21 = smov 0  }
   0x6 LB: > { %s2859_s22 = sadd.s32 4294967295, %s2793_s21   ;;  %s2054_s23 = sadd.s32 4294967294, %s2793_s21   ;;  %s2793_s21 = sphi %s2844_s21, %s3463_s21   ;;  %s2789_s20 = sphi %s2842_s20, %s3462_s20   ;;  %s2785_s19 = sphi %s2840_s19, %s3461_s19   ;;  %s2781_s18 = sphi %s2838_s18, %s3460_s18  }
   0x7   : > { %s2863_s24 = sadd.s32 1, %s2793_s21   ;;  %s29_s25 = sadd.s32 1, %s2789_s20 }
   0x8   : > { %s26_s26 = ssub.s32 %s2793_s21, %s2863_s24  ;;  %p36_p0 = scmp.ne.s32.totalorder %s2789_s20, %s2785_s19 }
   0x9   : > { %p27_p1 = scmp.eq.s32.totalorder %s26_s26, 0  ;;  %p37_p2 = scmp.eq.s32.totalorder %s2793_s21, 0 }
   0xa   : > { %p42_p3 = scmp.ne.s32.totalorder %s2785_s19, %s2781_s18  ;;  %p3442_p4 = scmp.eq.s32.totalorder %s2859_s22, 0 }
   0xb   : > { %s2875_s27 = scalar_select %p27_p1, %s2789_s20, %s29_s25  }
   0xc   : > { %p2877_p5 = por %p37_p2, %p36_p0  ;;  %p2883_p6 = por %p3442_p4, %p42_p3 }
   0xd   : > { %3445 = sst [smem:[#allocation12_spill]] %s2875_s27  ;;  %p150_p7 = scmp.eq.s32.totalorder %s2859_s22, 1 }
   0xe   : > { %s3446_s28 = scalar_select %p2877_p5, 1, 0 }
   0xf   : > { %s3447_s29 = scalar_select %p2883_p6, 1, 0 }
  0x10   : > { %p156_p8 = scmp.eq.s32.totalorder %s2054_s23, 1  ;;  %p2055_p9 = scmp.ge.s32.totalorder %s2793_s21, 1 }
  0x11   : > { %p163_p10 = scmp.lt.s32.totalorder %s2793_s21, 3  ;;  %p2890_p11 = por %p150_p7, %p36_p0 }
  0x12   : > { %p2894_p12 = por %p156_p8, %p42_p3  ;;  %s2795_s8 = smov [#allocation5]  }
  0x13   : > { %s3448_s30 = scalar_select %p2890_p11, 1, 0 }
  0x14   : > { %s3449_s6 = scalar_select %p2894_p12, 1, 0 }
  0x15   : > { %p2898_p13 = pnand %p2055_p9, %p163_p10  ;;  %s175_s9 = sshll.u32 %s2795_s8, 4  ;;  %s176_s9 = int_to_ptr.vmem [resolvable:$true] %s175_s9 }
  0x16   : > { %s2796_s11 = smov [#allocation7]   ;;  %s2639_s15 = scalar_lea.hbm %s3437_s1, 2048 }
  0x17   : > { %s3450_s7 = scalar_select %p2898_p13, 1, 0 }
  0x18   : > { %p2508_p1 = pneg %p2898_p13  ;;  %s191_s12 = sshll.u32 %s2796_s11, 4  ;;  %s2910_s12 = int_to_ptr.vmem [resolvable:$true] %s191_s12 }
  0x19   : > { %p2640_p0 = scmp.ne.s32.totalorder %s3437_s1, %s2639_s15  ;;  %p2646_p9 = scmp.lt.u32.totalorder %s2639_s15, %s3437_s1 }
  0x1a   : > { %p2906_p2 = pnand %p2508_p1, %p3442_p4 }
  0x1c   : > { %p2641_p3 = pneg %p2906_p2 }
  0x1e   : > { %p2642_p7 = pnand %p2641_p3, %p2640_p0 }
  0x20   : > { %p2643_p8 = pneg %p2642_p7 }
  0x22   : > { %p2648_p10 = pnand %p2646_p9, %p2643_p8 }
  0x24   : > { %2651 = shalt.err (!%p2648_p10)
}
  0x25   : > { %s2652_s26 = scalar_lea.vmem %s176_s9, 2048  ;;  %p2660_p11 = scmp.lt.s32.totalorder %s176_s9, %s176_s9 }
  0x26   : > { %p2653_p1 = scmp.ne.s32.totalorder %s176_s9, %s2652_s26  ;;  %p2661_p6 = scmp.lt.s32.totalorder %s2652_s26, %s2652_s26 }
  0x28   : > { %p2655_p4 = pnand %p2653_p1, %p2641_p3  ;;  %p2662_p13 = por %p2661_p6, %p2660_p11 }
  0x2a   : > { %p2656_p12 = pneg %p2655_p4 }
  0x2c   : > { %p2663_p5 = pnand %p2662_p13, %p2656_p12 }
  0x2e   : > { %2666 = shalt.err (!%p2663_p5)
}
  0x2f   : > { %s2797_s8 = smov 128   ;;  %s2798_s11 = smov 8  }
  0x30   : > { %2511 = dma.hbm_to_vmem [thread:$0]  (!%p2906_p2), %s3437_s1, 2048, %s176_s9, [#allocation6], %s2797_s8, %s2797_s8, %s2798_s11  }
  0x31   : > { %s2667_s17 = scalar_lea.hbm %s3439_s3, 2048 }
  0x32   : > { %p2668_p4 = scmp.ne.s32.totalorder %s3439_s3, %s2667_s17  ;;  %p2674_p11 = scmp.lt.u32.totalorder %s2667_s17, %s3439_s3 }
  0x34   : > { %p2670_p5 = pnand %p2668_p4, %p2641_p3 }
  0x36   : > { %p2671_p6 = pneg %p2670_p5 }
  0x38   : > { %p2676_p12 = pnand %p2674_p11, %p2671_p6 }
  0x3a   : > { %2679 = shalt.err (!%p2676_p12)
}
  0x3b   : > { %s2680_s9 = scalar_lea.vmem %s2910_s12, 2048  ;;  %p2688_p8 = scmp.lt.s32.totalorder %s2910_s12, %s2910_s12 }
  0x3c   : > { %p2681_p13 = scmp.ne.s32.totalorder %s2910_s12, %s2680_s9  ;;  %p2689_p9 = scmp.lt.s32.totalorder %s2680_s9, %s2680_s9 }
  0x3e   : > { %p2683_p0 = pnand %p2681_p13, %p2641_p3  ;;  %p2690_p10 = por %p2689_p9, %p2688_p8 }
  0x40   : > { %p2684_p7 = pneg %p2683_p0 }
  0x42   : > { %p2691_p1 = pnand %p2690_p10, %p2684_p7 }
  0x44   : > { %2694 = shalt.err (!%p2691_p1)
}
  0x45   : > { %s2799_s27 = smov 64   ;;  %s2800_s8 = smov 4  }
  0x46   : > { %2514 = dma.hbm_to_vmem [thread:$0]  (!%p2906_p2), %s3439_s3, 2048, %s2910_s12, [#allocation6], %s2799_s27, %s2799_s27, %s2800_s8  }
  0x47   : > { %p2058_p4 = scmp.ge.s32.totalorder %s2793_s21, 2 }
  0x48   : > { %p3452_p3 = scmp.ne.s32.totalorder (!%p2058_p4), %s3446_s28, 0 }
  0x49   : > { %204 = sbr.rel (%p2058_p4) target bundleno = 115 (0x73), region = 32 }
  0x50   : > { %207 = sbr.rel (!%p3452_p3) target bundleno = 115 (0x73), region = 36  ;;  %s208_s14 = sand.u32 (%p3452_p3), 1, %s2789_s20  }
  0x51   : > { %s2060_s15 = sshll.u32 (%p3452_p3), %s2793_s21, 6  ;;  %s2059_s16 = sshll.u32 (%p3452_p3), %s208_s14, 8 }
  0x52   : > { %s214_s17 = ssub.s32 (%p3452_p3), 80, %s2060_s15  ;;  %s2969_s23 = scalar_lea.sflag (%p3452_p3), [#allocation3], %s208_s14 }
  0x53   : > { %p215_p5 = scmp.lt.s32.totalorder (%p3452_p3), %s214_s17, 64  ;;  %s212_s25 = scalar_lea.vmem (%p3452_p3), [#allocation2], %s2059_s16 }
  0x57   : > { %s3465_s17 = smov (!%p215_p5, %s214_s17), 64 }
  0x58   : > { %s2966_s10 = sshll.u32 %s3465_s17, 6 }
  0x59   : > { %s219_s12 = ssub.s32 4096, %s2966_s10 }
  0x5a   : > { %220 = vsyncadd %s2969_s23, %s219_s12  ;;  %p2062_p2 = scmp.ne.s32.totalorder %s2966_s10, 0  ;;  %s2209_s28 = sshll.u32 %s2793_s21, 12 }
  0x5b   : > { %s2977_s27 = scalar_lea.hbm %s3436_s0, %s2209_s28  ;;  %s225_s8 = sshll.u32 %s212_s25, 4  ;;  %s2979_s8 = int_to_ptr.vmem [resolvable:$true] %s225_s8 }
  0x5c   : > { %s2695_s11 = scalar_lea.hbm %s2977_s27, %s2966_s10  ;;  %s2699_s15 = scalar_lea.hbm %s3436_s0, 5120 }
  0x5d   : > { %p2696_p6 = scmp.ne.s32.totalorder %s2977_s27, %s2695_s11  ;;  %p2700_p13 = scmp.lt.u32.totalorder %s2977_s27, %s3436_s0 }
  0x5e   : > { %p2701_p0 = scmp.lt.u32.totalorder %s2699_s15, %s2695_s11  ;;  %p2703_p8 = scmp.lt.u32.totalorder %s2695_s11, %s2977_s27 }
  0x5f   : > { %p2697_p11 = pnand %p2696_p6, %p2062_p2 }
  0x60   : > { %p2702_p7 = por %p2701_p0, %p2700_p13 }
  0x61   : > { %p2698_p12 = pneg %p2697_p11 }
  0x62   : > { %p2704_p9 = por %p2703_p8, %p2702_p7 }
  0x64   : > { %p2705_p10 = pnand %p2704_p9, %p2698_p12 }
  0x66   : > { %2708 = shalt.err (!%p2705_p10)
}
  0x67   : > { %s2709_s12 = scalar_lea.vmem %s2979_s8, %s2966_s10  ;;  %s2801_s25 = smov [#allocation2]  }
  0x68   : > { %p2710_p1 = scmp.ne.s32.totalorder %s2979_s8, %s2709_s12  ;;  %s2713_s28 = sshll.u32 %s2801_s25, 4  ;;  %s2714_s28 = int_to_ptr.vmem [resolvable:$false] %s2713_s28 }
  0x69   : > { %s2715_s26 = scalar_lea.vmem %s2714_s28, 8192  ;;  %p2716_p6 = scmp.lt.s32.totalorder %s2979_s8, %s2714_s28 }
  0x6a   : > { %p2711_p3 = pnand %p2710_p1, %p2062_p2  ;;  %p2717_p11 = scmp.lt.s32.totalorder %s2715_s26, %s2709_s12 }
  0x6c   : > { %p2712_p5 = pneg %p2711_p3  ;;  %p2718_p13 = por %p2717_p11, %p2716_p6 }
  0x6e   : > { %p2719_p0 = pnand %p2718_p13, %p2712_p5 }
  0x70   : > { %2722 = shalt.err (!%p2719_p0)
}
  0x71   : > { %s2802_s9 = smov 64   ;;  %s2803_s11 = smov 4  }
  0x72   : > { %231 = dma.hbm_to_vmem [thread:$0]  (%p2062_p2), %s2977_s27, %s2966_s10, %s2979_s8, %s2969_s23, %s2802_s9, %s2802_s9, %s2803_s11  }
  0x73 PF: > { %p3453_p12 = scmp.ne.s32.totalorder %s3450_s7, 0 }
  0x74   : > { %s3009_s13 = sand.u32 (!%p3453_p12), 1, %s2785_s19   ;;  %p3454_p7 = scmp.ne.s32.totalorder (!%p3453_p12), %s3447_s29, 0 }
  0x75   : > { %237 = sbr.rel (%p3453_p12) target bundleno = 879 (0x36f), region = 40  ;;  %s2067_s14 = sshll.u32 (!%p3453_p12), %s3009_s13, 8 }
  0x76   : > { %s240_s15 = scalar_lea.sflag (!%p3453_p12), [#allocation3], %s3009_s13  ;;  %s3015_s16 = scalar_lea.vmem (!%p3453_p12), [#allocation2], %s2067_s14 }
  0x7c   : > { %2768 = dma.done.wait (%p3454_p7), %s240_s15, 4096  }
  0x7d   : > { %2770 = vsyncadd (%p3454_p7), %s240_s15, 4294963200  ;;  %p3455_p2 = scmp.eq.s32.totalorder %s2859_s22, 0 }
  0x7f   : > { %2772 = dma.done.wait (%p3455_p2), [#allocation6], 4096   ;;  %p3456_p8 = pmov %p3455_p2 }
  0x80   : > { %v2804_v0 = vmov 0   ;;  %v2567_v1 = vld [vmem:[#allocation5 + $0x4] ss:$8 sps:$4 sm:$0xff]   ;;  %v2569_v2 = vld [vmem:[#allocation5] ss:$8 sps:$4 sm:$0xff]   ;;  %v2593_v19 = vld [vmem:[%s3015_s16 + $0x10] sm:$0xff]   ;;  %v371_v59 = vlaneseq }
  0x81   : > { %2774 = vsyncadd (%p3456_p8), [#allocation6], 4294963200  ;;  %685 = vmatprep.mubr.bf16.mxu0 %v2804_v0  ;;  %2466 = vmatprep.subr.bf16.mxu1 %v2804_v0  ;;  %v2570_v3 = vld [vmem:[#allocation5 + $0x14] ss:$8 sps:$4 sm:$0xff]   ;;  %v2572_v4 = vld [vmem:[#allocation5 + $0x10] ss:$8 sps:$4 sm:$0xff]  }
  0x82   : > { %653 = vmatprep.subr.bf16.mxu0 %v2567_v1  ;;  %v2573_v5 = vld [vmem:[#allocation5 + $0x24] ss:$8 sps:$4 sm:$0xff]   ;;  %v2575_v6 = vld [vmem:[#allocation5 + $0x20] ss:$8 sps:$4 sm:$0xff]   ;;  %v2576_v7 = vld [vmem:[#allocation5 + $0x34] ss:$8 sps:$4 sm:$0xff]  }
  0x83   : > { %654 = vmatpush1.bf16.msra.mxu0 %v2569_v2  ;;  %v2578_v8 = vld [vmem:[#allocation5 + $0x30] ss:$8 sps:$4 sm:$0xff]   ;;  %v2579_v9 = vld [vmem:[#allocation5 + $0x44] ss:$8 sps:$4 sm:$0xff]   ;;  %v2581_v10 = vld [vmem:[#allocation5 + $0x40] ss:$8 sps:$4 sm:$0xff]  }
  0x84   : > { %655 = vmatprep.subr.bf16.mxu0 %v2570_v3  ;;  %v2582_v11 = vld [vmem:[#allocation5 + $0x54] ss:$8 sps:$4 sm:$0xff]   ;;  %v2584_v12 = vld [vmem:[#allocation5 + $0x50] ss:$8 sps:$4 sm:$0xff]   ;;  %v2585_v13 = vld [vmem:[#allocation5 + $0x64] ss:$8 sps:$4 sm:$0xff]  }
  0x85   : > { %v2587_v14 = vld [vmem:[#allocation5 + $0x60] ss:$8 sps:$4 sm:$0xff]   ;;  %v2588_v15 = vld [vmem:[#allocation5 + $0x74] ss:$8 sps:$4 sm:$0xff]   ;;  %v2590_v16 = vld [vmem:[#allocation5 + $0x70] ss:$8 sps:$4 sm:$0xff]  }
  0x86   : > { %v2591_v17 = vld [vmem:[%s3015_s16] sm:$0xff]   ;;  %v2592_v18 = vld [vmem:[%s3015_s16 + $0x8] sm:$0xff]   ;;  %v2594_v20 = vld [vmem:[%s3015_s16 + $0x18] sm:$0xff]   ;;  %v372_v60 = vshrl.u32 %v371_v59, 7  ;;  %s3273_s27 = scalar_lea.vmem [#allocation8], %s2067_s14  ;;  %s1943_s8 = scalar_lea.sflag [#allocation4], %s3009_s13 }
  0x87   : > { %656 = vmatpush1.bf16.msra.mxu0 %v2572_v4  ;;  %v2595_v21 = vld [vmem:[%s3015_s16 + $0x20] sm:$0xff]   ;;  %v2596_v22 = vld [vmem:[%s3015_s16 + $0x28] sm:$0xff]   ;;  %v2597_v24 = vld [vmem:[%s3015_s16 + $0x30] sm:$0xff]   ;;  %p3457_p9 = scmp.ne.s32.totalorder %s3448_s30, 0 }
  0x88   : > { %657 = vmatprep.subr.bf16.mxu0 %v2573_v5  ;;  %v2613_v23 = vld [vmem:[#allocation7] sm:$0xff]   ;;  %v2615_v25 = vld [vmem:[#allocation7 + $0x8] sm:$0xff]   ;;  %v2616_v26 = vld [vmem:[#allocation7 + $0x10] sm:$0xff]   ;;  %v373_v62 = vsub.s32 0, %v372_v60  ;;  %v377_v1 = vsub.s32 1, %v372_v60  ;;  %s2201_s17 = sshll.u32 (%p3457_p9), %s2859_s22, 6 }
  0x89   : > { %2482 = vmatpush1.bf16.msra.mxu1 %v2613_v23  ;;  %v2598_v27 = vld [vmem:[%s3015_s16 + $0x38] sm:$0xff]   ;;  %v2619_v29 = vld [vmem:[#allocation7 + $0x20] sm:$0xff]   ;;  %v2621_v31 = vld [vmem:[#allocation7 + $0x28] sm:$0xff]   ;;  %s1951_s12 = ssub.s32 (%p3457_p9), 80, %s2201_s17 }
  0x8a   : > { %2467 = vmatprep.subr.bf16.mxu1 %v2804_v0  ;;  %v2618_v28 = vld [vmem:[#allocation7 + $0x18] sm:$0xff]   ;;  %v2599_v30 = vld [vmem:[%s3015_s16 + $0x40] sm:$0xff]   ;;  %v2622_v32 = vld [vmem:[#allocation7 + $0x30] sm:$0xff]   ;;  %p1952_p10 = scmp.lt.s32.totalorder (%p3457_p9), %s1951_s12, 64 }
  0x8b   : > { %658 = vmatpush1.bf16.msra.mxu0 %v2575_v6  ;;  %v2600_v33 = vld [vmem:[%s3015_s16 + $0x48] sm:$0xff]   ;;  %v2624_v34 = vld [vmem:[#allocation7 + $0x38] sm:$0xff]   ;;  %v2625_v35 = vld [vmem:[#allocation7 + $0x40] sm:$0xff]  }
  0x8c   : > { %659 = vmatprep.subr.bf16.mxu0 %v2576_v7  ;;  %v2601_v36 = vld [vmem:[%s3015_s16 + $0x50] sm:$0xff]   ;;  %v2627_v37 = vld [vmem:[#allocation7 + $0x48] sm:$0xff]   ;;  %v2602_v38 = vld [vmem:[%s3015_s16 + $0x58] sm:$0xff]  }
  0x8d   : > { %2483 = vmatpush1.bf16.msra.mxu1 %v2615_v25  ;;  %v2628_v39 = vld [vmem:[#allocation7 + $0x50] sm:$0xff]   ;;  %v2630_v40 = vld [vmem:[#allocation7 + $0x58] sm:$0xff]   ;;  %v2603_v41 = vld [vmem:[%s3015_s16 + $0x60] sm:$0xff]  }
  0x8e   : > { %2468 = vmatprep.subr.bf16.mxu1 %v2804_v0  ;;  %v2631_v42 = vld [vmem:[#allocation7 + $0x60] sm:$0xff]   ;;  %v2633_v43 = vld [vmem:[#allocation7 + $0x68] sm:$0xff]   ;;  %v2634_v45 = vld [vmem:[#allocation7 + $0x70] sm:$0xff]  }
  0x8f   : > { %660 = vmatpush1.bf16.msra.mxu0 %v2578_v8  ;;  %v2604_v44 = vld [vmem:[%s3015_s16 + $0x68] sm:$0xff]   ;;  %v2636_v46 = vld [vmem:[#allocation7 + $0x78] sm:$0xff]   ;;  %v2605_v47 = vld [vmem:[%s3015_s16 + $0x70] sm:$0xff]  }
  0x90   : > { %661 = vmatprep.subr.bf16.mxu0 %v2579_v9  ;;  %v2606_v48 = vld [vmem:[%s3015_s16 + $0x78] sm:$0xff]   ;;  %v2607_v49 = vld [vmem:[%s3015_s16 + $0x80] sm:$0xff]   ;;  %v2608_v50 = vld [vmem:[%s3015_s16 + $0x88] sm:$0xff]  }
  0x91   : > { %2484 = vmatpush1.bf16.msra.mxu1 %v2616_v26  ;;  %v2609_v51 = vld [vmem:[%s3015_s16 + $0x90] sm:$0xff]   ;;  %v2610_v52 = vld [vmem:[%s3015_s16 + $0x98] sm:$0xff]   ;;  %v2611_v53 = vld [vmem:[%s3015_s16 + $0xa0] sm:$0xff]  }
  0x92   : > { %2469 = vmatprep.subr.bf16.mxu1 %v2804_v0  ;;  %v2612_v54 = vld [vmem:[%s3015_s16 + $0xa8] sm:$0xff]   ;;  %v2614_v55 = vld [vmem:[%s3015_s16 + $0xb0] sm:$0xff]   ;;  %v2617_v56 = vld [vmem:[%s3015_s16 + $0xb8] sm:$0xff]  }
  0x93   : > { %662 = vmatpush1.bf16.msra.mxu0 %v2581_v10  ;;  %v2620_v57 = vld [vmem:[%s3015_s16 + $0xc0] sm:$0xff]   ;;  %v2623_v58 = vld [vmem:[%s3015_s16 + $0xc8] sm:$0xff]   ;;  %v2626_v61 = vld [vmem:[%s3015_s16 + $0xd0] sm:$0xff]  }
  0x94   : > { %663 = vmatprep.subr.bf16.mxu0 %v2582_v11  ;;  %v369_v63 = vld [vmem:[%s3438_s2] sm:$0x3]  ;;  %v2629_v7 = vld [vmem:[%s3015_s16 + $0xd8] sm:$0xff]  }
  0x95   : > { %2485 = vmatpush1.bf16.msra.mxu1 %v2618_v28  ;;  %v3114_v2 = vrot.slane %v369_v63, %v373_v62  ;;  %v3116_v3 = vrot.slane %v369_v63, %v377_v1 }
  0x96   : > { %2470 = vmatprep.subr.bf16.mxu1 %v2804_v0 }
  0x97   : > { %664 = vmatpush1.bf16.msra.mxu0 %v2584_v12 }
  0x98   : > { %665 = vmatprep.subr.bf16.mxu0 %v2585_v13 }
  0x99   : > { %2486 = vmatpush1.bf16.msra.mxu1 %v2619_v29 }
  0x9a   : > { %2471 = vmatprep.subr.bf16.mxu1 %v2804_v0 }
  0x9b   : > { %666 = vmatpush1.bf16.msra.mxu0 %v2587_v14 }
  0x9c   : > { %667 = vmatprep.subr.bf16.mxu0 %v2588_v15 }
  0x9d   : > { %2487 = vmatpush1.bf16.msra.mxu1 %v2621_v31 }
  0x9e   : > { %2472 = vmatprep.subr.bf16.mxu1 %v2804_v0 }
  0x9f   : > { %668 = vmatpush1.bf16.msra.mxu0 %v2590_v16 }
  0xa0   : > { %1333 = vmatprep.subr.bf16.mxu0 %v2804_v0 }
  0xa1   : > { %2488 = vmatpush1.bf16.msra.mxu1 %v2622_v32 }
  0xa2   : > { %686 = vmatmul.mubr.bf16.vlgmr.msra.gmra.mrb[0].mxu0 %v2591_v17  ;;  %2473 = vmatprep.subr.bf16.mxu1 %v2804_v0 }
  0xa3   : > { %695 = vmatprep.mubr.bf16.mxu0 %v2804_v0  ;;  %1334 = vmatpush1.bf16.msra.mxu0 %v2613_v23 }
  0xa4   : > { %1335 = vmatprep.subr.bf16.mxu0 %v2804_v0 }
  0xa5   : > { %2489 = vmatpush1.bf16.msra.mxu1 %v2624_v34 }
  0xa6   : > { %2474 = vmatprep.subr.bf16.mxu1 %v2804_v0 }
  0xa7   : > { %1336 = vmatpush1.bf16.msra.mxu0 %v2615_v25 }
  0xa8   : > { %1337 = vmatprep.subr.bf16.mxu0 %v2804_v0 }
  0xa9   : > { %2490 = vmatpush1.bf16.msra.mxu1 %v2625_v35 }
  0xaa   : > { %696 = vmatmul.mubr.bf16.gmra.mrb[4].mxu0 %v2592_v18  ;;  %2475 = vmatprep.subr.bf16.mxu1 %v2804_v0 }
  0xab   : > { %705 = vmatprep.mubr.bf16.mxu0 %v2804_v0  ;;  %1338 = vmatpush1.bf16.msra.mxu0 %v2616_v26 }
  0xac   : > { %1339 = vmatprep.subr.bf16.mxu0 %v2804_v0 }
  0xad   : > { %2491 = vmatpush1.bf16.msra.mxu1 %v2627_v37 }
  0xae   : > { %2476 = vmatprep.subr.bf16.mxu1 %v2804_v0 }
  0xaf   : > { %1340 = vmatpush1.bf16.msra.mxu0 %v2618_v28 }
  0xb0   : > { %1341 = vmatprep.subr.bf16.mxu0 %v2804_v0 }
  0xb1   : > { %2492 = vmatpush1.bf16.msra.mxu1 %v2628_v39 }
  0xb2   : > { %706 = vmatmul.mubr.bf16.gmra.mrb[8].mxu0 %v2593_v19  ;;  %2477 = vmatprep.subr.bf16.mxu1 %v2804_v0 }
  0xb3   : > { %715 = vmatprep.mubr.bf16.mxu0 %v2804_v0  ;;  %1342 = vmatpush1.bf16.msra.mxu0 %v2619_v29 }
  0xb4   : > { %1343 = vmatprep.subr.bf16.mxu0 %v2804_v0 }
  0xb5   : > { %2493 = vmatpush1.bf16.msra.mxu1 %v2630_v40 }
  0xb6   : > { %2478 = vmatprep.subr.bf16.mxu1 %v2804_v0 }
  0xb7   : > { %1344 = vmatpush1.bf16.msra.mxu0 %v2621_v31 }
  0xb8   : > { %1345 = vmatprep.subr.bf16.mxu0 %v2804_v0 }
  0xb9   : > { %2494 = vmatpush1.bf16.msra.mxu1 %v2631_v42 }
  0xba   : > { %716 = vmatmul.mubr.bf16.gmra.mrb[12].mxu0 %v2594_v20  ;;  %2479 = vmatprep.subr.bf16.mxu1 %v2804_v0 }
  0xbb   : > { %725 = vmatprep.mubr.bf16.mxu0 %v2804_v0  ;;  %1346 = vmatpush1.bf16.msra.mxu0 %v2622_v32 }
  0xbc   : > { %1347 = vmatprep.subr.bf16.mxu0 %v2804_v0 }
  0xbd   : > { %2495 = vmatpush1.bf16.msra.mxu1 %v2633_v43 }
  0xbe   : > { %2480 = vmatprep.subr.bf16.mxu1 %v2804_v0 }
  0xbf   : > { %1348 = vmatpush1.bf16.msra.mxu0 %v2624_v34 }
  0xc0   : > { %1349 = vmatprep.subr.bf16.mxu0 %v2804_v0 }
  0xc1   : > { %2496 = vmatpush1.bf16.msra.mxu1 %v2634_v45 }
  0xc2   : > { %726 = vmatmul.mubr.bf16.gmra.mrb[16].mxu0 %v2595_v21  ;;  %2481 = vmatprep.subr.bf16.mxu1 %v2804_v0 }
  0xc3   : > { %735 = vmatprep.mubr.bf16.mxu0 %v2804_v0  ;;  %1350 = vmatpush1.bf16.msra.mxu0 %v2625_v35 }
  0xc4   : > { %1351 = vmatprep.subr.bf16.mxu0 %v2804_v0 }
  0xc5   : > { %2497 = vmatpush1.bf16.msra.mxu1 %v2636_v46 }
  0xc7   : > { %1352 = vmatpush1.bf16.msra.mxu0 %v2627_v37  ;;  %v2635_v37 = vld [vmem:[%s3015_s16 + $0xe8] sm:$0xff]  }
  0xc8   : > { %1353 = vmatprep.subr.bf16.mxu0 %v2804_v0 }
  0xca   : > { %736 = vmatmul.mubr.bf16.gmra.mrb[20].mxu0 %v2596_v22  ;;  %v2632_v22 = vld [vmem:[%s3015_s16 + $0xe0] sm:$0xff]  }
  0xcb   : > { %745 = vmatprep.mubr.bf16.mxu0 %v2804_v0  ;;  %1354 = vmatpush1.bf16.msra.mxu0 %v2628_v39 }
  0xcc   : > { %1355 = vmatprep.subr.bf16.mxu0 %v2804_v0 }
  0xcf   : > { %1356 = vmatpush1.bf16.msra.mxu0 %v2630_v40 }
  0xd0   : > { %1357 = vmatprep.subr.bf16.mxu0 %v2804_v0 }
  0xd2   : > { %746 = vmatmul.mubr.bf16.gmra.mrb[24].mxu0 %v2597_v24 }
  0xd3   : > { %755 = vmatprep.mubr.bf16.mxu0 %v2804_v0  ;;  %1358 = vmatpush1.bf16.msra.mxu0 %v2631_v42 }
  0xd4   : > { %1359 = vmatprep.subr.bf16.mxu0 %v2804_v0 }
  0xd7   : > { %1360 = vmatpush1.bf16.msra.mxu0 %v2633_v43 }
  0xd8   : > { %1361 = vmatprep.subr.bf16.mxu0 %v2804_v0 }
  0xda   : > { %756 = vmatmul.mubr.bf16.gmra.mrb[28].mxu0 %v2598_v27 }
  0xdb   : > { %765 = vmatprep.mubr.bf16.mxu0 %v2804_v0  ;;  %1362 = vmatpush1.bf16.msra.mxu0 %v2634_v45 }
  0xdc   : > { %1363 = vmatprep.subr.bf16.mxu0 %v2804_v0 }
  0xdf   : > { %1364 = vmatpush1.bf16.msra.mxu0 %v2636_v46 }
  0xe2   : > { %766 = vmatmul.mubr.bf16.gmra.mrb[32].mxu0 %v2599_v30 }
  0xe3   : > { %775 = vmatprep.mubr.bf16.mxu0 %v2804_v0 }
  0xea   : > { %776 = vmatmul.mubr.bf16.gmra.mrb[36].mxu0 %v2600_v33 }
  0xeb   : > { %785 = vmatprep.mubr.bf16.mxu0 %v2804_v0 }
  0xf2   : > { %786 = vmatmul.mubr.bf16.gmra.mrb[40].mxu0 %v2601_v36 }
  0xf3   : > { %795 = vmatprep.mubr.bf16.mxu0 %v2804_v0 }
  0xfa   : > { %796 = vmatmul.mubr.bf16.gmra.mrb[44].mxu0 %v2602_v38 }
  0xfb   : > { %805 = vmatprep.mubr.bf16.mxu0 %v2804_v0 }
 0x102   : > { %806 = vmatmul.mubr.bf16.gmra.mrb[48].mxu0 %v2603_v41 }
 0x103   : > { %815 = vmatprep.mubr.bf16.mxu0 %v2804_v0 }
 0x10a   : > { %816 = vmatmul.mubr.bf16.gmra.mrb[52].mxu0 %v2604_v44 }
 0x10b   : > { %825 = vmatprep.mubr.bf16.mxu0 %v2804_v0 }
 0x112   : > { %826 = vmatmul.mubr.bf16.gmra.mrb[56].mxu0 %v2605_v47 }
 0x113   : > { %835 = vmatprep.mubr.bf16.mxu0 %v2804_v0 }
 0x11a   : > { %836 = vmatmul.mubr.bf16.gmra.mrb[60].mxu0 %v2606_v48 }
 0x11b   : > { %845 = vmatprep.mubr.bf16.mxu0 %v2804_v0 }
 0x122   : > { %846 = vmatmul.mubr.bf16.gmra.mrb[64].mxu0 %v2607_v49 }
 0x123   : > { %855 = vmatprep.mubr.bf16.mxu0 %v2804_v0 }
 0x12a   : > { %856 = vmatmul.mubr.bf16.gmra.mrb[68].mxu0 %v2608_v50 }
 0x12b   : > { %865 = vmatprep.mubr.bf16.mxu0 %v2804_v0 }
 0x132   : > { %866 = vmatmul.mubr.bf16.gmra.mrb[72].mxu0 %v2609_v51 }
 0x133   : > { %875 = vmatprep.mubr.bf16.mxu0 %v2804_v0 }
 0x13a   : > { %876 = vmatmul.mubr.bf16.gmra.mrb[76].mxu0 %v2610_v52  ;;  %v2637_v52 = vld [vmem:[%s3015_s16 + $0xf0] sm:$0xff]  }
 0x13b   : > { %885 = vmatprep.mubr.bf16.mxu0 %v2804_v0 }
 0x142   : > { %886 = vmatmul.mubr.bf16.gmra.mrb[80].mxu0 %v2611_v53 }
 0x143   : > { %895 = vmatprep.mubr.bf16.mxu0 %v2804_v0 }
 0x14a   : > { %896 = vmatmul.mubr.bf16.gmra.mrb[84].mxu0 %v2612_v54 }
 0x14b   : > { %905 = vmatprep.mubr.bf16.mxu0 %v2804_v0 }
 0x152   : > { %906 = vmatmul.mubr.bf16.gmra.mrb[88].mxu0 %v2614_v55 }
 0x153   : > { %915 = vmatprep.mubr.bf16.mxu0 %v2804_v0 }
 0x15a   : > { %916 = vmatmul.mubr.bf16.gmra.mrb[92].mxu0 %v2617_v56 }
 0x15b   : > { %925 = vmatprep.mubr.bf16.mxu0 %v2804_v0 }
 0x162   : > { %926 = vmatmul.mubr.bf16.gmra.mrb[96].mxu0 %v2620_v57 }
 0x163   : > { %935 = vmatprep.mubr.bf16.mxu0 %v2804_v0 }
 0x16a   : > { %936 = vmatmul.mubr.bf16.gmra.mrb[100].mxu0 %v2623_v58 }
 0x16b   : > { %945 = vmatprep.mubr.bf16.mxu0 %v2804_v0 }
 0x172   : > { %946 = vmatmul.mubr.bf16.gmra.mrb[104].mxu0 %v2626_v61 }
 0x173   : > { %955 = vmatprep.mubr.bf16.mxu0 %v2804_v0 }
 0x175   : > { %v687_v4 = vpop.f32.mrb[0].mxu0 }
 0x176   : > { %v688_v5 = vadd.f32 %v687_v4, %v3114_v2  ;;  %v689_v6 = vpop.f32.mrb[1].mxu0 }
 0x177   : > { %v690_v8 = vadd.f32 %v689_v6, %v3116_v3  ;;  %v691_v9 = vpop.f32.mrb[2].mxu0  ;;  %v2638_v6 = vld [vmem:[%s3015_s16 + $0xf8] sm:$0xff]  }
 0x178   : > { %v692_v10 = vadd.f32 %v691_v9, %v3114_v2  ;;  %v693_v11 = vpop.f32.mrb[3].mxu0  ;;  %v1006_v13 = vmax.f32 %v688_v5, 0.0 }
 0x179   : > { %v694_v12 = vadd.f32 %v693_v11, %v3116_v3  ;;  %v1007_v15 = vmax.f32 %v690_v8, 0.0 }
 0x17a   : > { %v1008_v14 = vmax.f32 %v692_v10, 0.0  ;;  %956 = vmatmul.mubr.bf16.gmra.mrb[108].mxu0 %v2629_v7 }
 0x17b   : > { %v1009_v16 = vmax.f32 %v694_v12, 0.0  ;;  %965 = vmatprep.mubr.bf16.mxu0 %v2804_v0 }
 0x17c   : > { %v3125_v17 = vpack.c.bf16 %v1008_v14, %v1006_v13 }
 0x17d   : > { %v3127_v18 = vpack.c.bf16 %v1009_v16, %v1007_v15  ;;  %v697_v19 = vpop.f32.mrb[4].mxu0 }
 0x17e   : > { %v698_v20 = vadd.f32 %v697_v19, %v3114_v2  ;;  %v699_v21 = vpop.f32.mrb[5].mxu0 }
 0x17f   : > { %v700_v23 = vadd.f32 %v699_v21, %v3116_v3  ;;  %v701_v24 = vpop.f32.mrb[6].mxu0 }
 0x180   : > { %v702_v25 = vadd.f32 %v701_v24, %v3114_v2  ;;  %v703_v26 = vpop.f32.mrb[7].mxu0  ;;  %v1010_v28 = vmax.f32 %v698_v20, 0.0 }
 0x181   : > { %v704_v27 = vadd.f32 %v703_v26, %v3116_v3  ;;  %v1011_v30 = vmax.f32 %v700_v23, 0.0 }
 0x182   : > { %v1012_v29 = vmax.f32 %v702_v25, 0.0  ;;  %966 = vmatmul.mubr.bf16.gmra.mrb[112].mxu0 %v2632_v22 }
 0x183   : > { %v1013_v31 = vmax.f32 %v704_v27, 0.0  ;;  %975 = vmatprep.mubr.bf16.mxu0 %v2804_v0 }
 0x184   : > { %v3135_v32 = vpack.c.bf16 %v1012_v29, %v1010_v28 }
 0x185   : > { %v3137_v33 = vpack.c.bf16 %v1013_v31, %v1011_v30  ;;  %v707_v34 = vpop.f32.mrb[8].mxu0 }
 0x186   : > { %v708_v35 = vadd.f32 %v707_v34, %v3114_v2  ;;  %v709_v36 = vpop.f32.mrb[9].mxu0 }
 0x187   : > { %v710_v38 = vadd.f32 %v709_v36, %v3116_v3  ;;  %v711_v39 = vpop.f32.mrb[10].mxu0 }
 0x188   : > { %v712_v40 = vadd.f32 %v711_v39, %v3114_v2  ;;  %v713_v41 = vpop.f32.mrb[11].mxu0  ;;  %v1014_v43 = vmax.f32 %v708_v35, 0.0 }
 0x189   : > { %v714_v42 = vadd.f32 %v713_v41, %v3116_v3  ;;  %v1015_v45 = vmax.f32 %v710_v38, 0.0 }
 0x18a   : > { %v1016_v44 = vmax.f32 %v712_v40, 0.0  ;;  %976 = vmatmul.mubr.bf16.gmra.mrb[116].mxu0 %v2635_v37 }
 0x18b   : > { %v1017_v46 = vmax.f32 %v714_v42, 0.0  ;;  %985 = vmatprep.mubr.bf16.mxu0 %v2804_v0 }
 0x18c   : > { %v1138_v47 = vpack.c.bf16 %v1016_v44, %v1014_v43 }
 0x18d   : > { %v717_v48 = vpop.f32.mrb[12].mxu0  ;;  %v1139_v49 = vpack.c.bf16 %v1017_v46, %v1015_v45 }
 0x18e   : > { %v718_v50 = vadd.f32 %v717_v48, %v3114_v2  ;;  %v719_v51 = vpop.f32.mrb[13].mxu0 }
 0x18f   : > { %v720_v53 = vadd.f32 %v719_v51, %v3116_v3  ;;  %v721_v54 = vpop.f32.mrb[14].mxu0  ;;  %1381 = vmatprep.mubr.bf16.mxu1 %v1139_v49 }
 0x190   : > { %v722_v55 = vadd.f32 %v721_v54, %v3114_v2  ;;  %v723_v56 = vpop.f32.mrb[15].mxu0  ;;  %1382 = vmatmul.mubr.bf16.vlgmr.msra.gmra.mrb[0].mxu1 %v1138_v47  ;;  %v1018_v58 = vmax.f32 %v718_v50, 0.0 }
 0x191   : > { %v724_v57 = vadd.f32 %v723_v56, %v3116_v3  ;;  %v1019_v60 = vmax.f32 %v720_v53, 0.0 }
 0x192   : > { %v1020_v59 = vmax.f32 %v722_v55, 0.0  ;;  %986 = vmatmul.mubr.bf16.gmra.mrb[120].mxu0 %v2637_v52 }
 0x193   : > { %v1021_v61 = vmax.f32 %v724_v57, 0.0  ;;  %995 = vmatprep.mubr.bf16.mxu0 %v2804_v0 }
 0x194   : > { %v1140_v62 = vpack.c.bf16 %v1020_v59, %v1018_v58 }
 0x195   : > { %v1141_v63 = vpack.c.bf16 %v1021_v61, %v1019_v60  ;;  %v727_v1 = vpop.f32.mrb[16].mxu0 }
 0x196   : > { %v728_v4 = vadd.f32 %v727_v1, %v3114_v2  ;;  %v729_v5 = vpop.f32.mrb[17].mxu0 }
 0x197   : > { %v730_v7 = vadd.f32 %v729_v5, %v3116_v3  ;;  %v731_v8 = vpop.f32.mrb[18].mxu0  ;;  %1389 = vmatprep.mubr.bf16.mxu1 %v1141_v63 }
 0x198   : > { %v732_v9 = vadd.f32 %v731_v8, %v3114_v2  ;;  %v733_v10 = vpop.f32.mrb[19].mxu0  ;;  %1390 = vmatmul.mubr.bf16.gmra.mrb[4].mxu1 %v1140_v62  ;;  %v1022_v12 = vmax.f32 %v728_v4, 0.0 }
 0x199   : > { %v734_v11 = vadd.f32 %v733_v10, %v3116_v3  ;;  %v1023_v0 = vmax.f32 %v730_v7, 0.0 }
 0x19a   : > { %v1024_v13 = vmax.f32 %v732_v9, 0.0  ;;  %996 = vmatmul.mubr.bf16.gmra.mrb[124].mxu0 %v2638_v6 }
 0x19b   : > { %v1025_v14 = vmax.f32 %v734_v11, 0.0  ;;  %1365 = vmatprep.mubr.bf16.mxu0 %v3127_v18 }
 0x19c   : > { %v1142_v15 = vpack.c.bf16 %v1024_v13, %v1022_v12 }
 0x19d   : > { %v1143_v16 = vpack.c.bf16 %v1025_v14, %v1023_v0  ;;  %v737_v19 = vpop.f32.mrb[20].mxu0 }
 0x19e   : > { %v738_v20 = vadd.f32 %v737_v19, %v3114_v2  ;;  %v739_v21 = vpop.f32.mrb[21].mxu0 }
 0x19f   : > { %v740_v22 = vadd.f32 %v739_v21, %v3116_v3  ;;  %v741_v23 = vpop.f32.mrb[22].mxu0  ;;  %1397 = vmatprep.mubr.bf16.mxu1 %v1143_v16 }
 0x1a0   : > { %v742_v24 = vadd.f32 %v741_v23, %v3114_v2  ;;  %v743_v25 = vpop.f32.mrb[23].mxu0  ;;  %1398 = vmatmul.mubr.bf16.gmra.mrb[8].mxu1 %v1142_v15  ;;  %v1026_v27 = vmax.f32 %v738_v20, 0.0 }
 0x1a1   : > { %v744_v26 = vadd.f32 %v743_v25, %v3116_v3  ;;  %v1027_v18 = vmax.f32 %v740_v22, 0.0 }
 0x1a2   : > { %v1028_v28 = vmax.f32 %v742_v24, 0.0  ;;  %1366 = vmatmul.mubr.bf16.vlgmr.msra.gmra.mrb[128].mxu0 %v3125_v17 }
 0x1a3   : > { %v1029_v29 = vmax.f32 %v744_v26, 0.0  ;;  %1373 = vmatprep.mubr.bf16.mxu0 %v3137_v33 }
 0x1a4   : > { %v1144_v30 = vpack.c.bf16 %v1028_v28, %v1026_v27 }
 0x1a5   : > { %v1145_v31 = vpack.c.bf16 %v1029_v29, %v1027_v18  ;;  %v747_v34 = vpop.f32.mrb[24].mxu0 }
 0x1a6   : > { %v748_v35 = vadd.f32 %v747_v34, %v3114_v2  ;;  %v749_v36 = vpop.f32.mrb[25].mxu0 }
 0x1a7   : > { %v750_v37 = vadd.f32 %v749_v36, %v3116_v3  ;;  %v751_v38 = vpop.f32.mrb[26].mxu0  ;;  %1405 = vmatprep.mubr.bf16.mxu1 %v1145_v31 }
 0x1a8   : > { %v752_v39 = vadd.f32 %v751_v38, %v3114_v2  ;;  %v753_v40 = vpop.f32.mrb[27].mxu0  ;;  %1406 = vmatmul.mubr.bf16.gmra.mrb[12].mxu1 %v1144_v30  ;;  %v1030_v41 = vmax.f32 %v748_v35, 0.0 }
 0x1a9   : > { %v754_v17 = vadd.f32 %v753_v40, %v3116_v3  ;;  %v1031_v33 = vmax.f32 %v750_v37, 0.0 }
 0x1aa   : > { %v1032_v42 = vmax.f32 %v752_v39, 0.0  ;;  %1374 = vmatmul.mubr.bf16.gmra.mrb[132].mxu0 %v3135_v32 }
 0x1ab   : > { %v1033_v43 = vmax.f32 %v754_v17, 0.0 }
 0x1ac   : > { %v1146_v44 = vpack.c.bf16 %v1032_v42, %v1030_v41 }
 0x1ad   : > { %v1147_v45 = vpack.c.bf16 %v1033_v43, %v1031_v33  ;;  %v757_v46 = vpop.f32.mrb[28].mxu0 }
 0x1ae   : > { %v758_v47 = vadd.f32 %v757_v46, %v3114_v2  ;;  %v759_v48 = vpop.f32.mrb[29].mxu0 }
 0x1af   : > { %v760_v49 = vadd.f32 %v759_v48, %v3116_v3  ;;  %v761_v50 = vpop.f32.mrb[30].mxu0  ;;  %1413 = vmatprep.mubr.bf16.mxu1 %v1147_v45 }
 0x1b0   : > { %v762_v51 = vadd.f32 %v761_v50, %v3114_v2  ;;  %v763_v52 = vpop.f32.mrb[31].mxu0  ;;  %1414 = vmatmul.mubr.bf16.gmra.mrb[16].mxu1 %v1146_v44  ;;  %v1034_v54 = vmax.f32 %v758_v47, 0.0 }
 0x1b1   : > { %v764_v53 = vadd.f32 %v763_v52, %v3116_v3  ;;  %v1035_v55 = vmax.f32 %v760_v49, 0.0 }
 0x1b2   : > { %v1036_v32 = vmax.f32 %v762_v51, 0.0 }
 0x1b3   : > { %v1037_v56 = vmax.f32 %v764_v53, 0.0 }
 0x1b4   : > { %v1148_v57 = vpack.c.bf16 %v1036_v32, %v1034_v54 }
 0x1b5   : > { %v1149_v58 = vpack.c.bf16 %v1037_v56, %v1035_v55  ;;  %v767_v59 = vpop.f32.mrb[32].mxu0 }
 0x1b6   : > { %v768_v60 = vadd.f32 %v767_v59, %v3114_v2  ;;  %v769_v61 = vpop.f32.mrb[33].mxu0 }
 0x1b7   : > { %v770_v62 = vadd.f32 %v769_v61, %v3116_v3  ;;  %v771_v63 = vpop.f32.mrb[34].mxu0  ;;  %1421 = vmatprep.mubr.bf16.mxu1 %v1149_v58 }
 0x1b8   : > { %v772_v1 = vadd.f32 %v771_v63, %v3114_v2  ;;  %v773_v4 = vpop.f32.mrb[35].mxu0  ;;  %1422 = vmatmul.mubr.bf16.gmra.mrb[20].mxu1 %v1148_v57  ;;  %v1038_v6 = vmax.f32 %v768_v60, 0.0 }
 0x1b9   : > { %v774_v5 = vadd.f32 %v773_v4, %v3116_v3  ;;  %v1039_v8 = vmax.f32 %v770_v62, 0.0 }
 0x1ba   : > { %v1040_v7 = vmax.f32 %v772_v1, 0.0 }
 0x1bb   : > { %v1041_v9 = vmax.f32 %v774_v5, 0.0 }
 0x1bc   : > { %v1150_v10 = vpack.c.bf16 %v1040_v7, %v1038_v6 }
 0x1bd   : > { %v1151_v11 = vpack.c.bf16 %v1041_v9, %v1039_v8  ;;  %v777_v12 = vpop.f32.mrb[36].mxu0 }
 0x1be   : > { %v778_v13 = vadd.f32 %v777_v12, %v3114_v2  ;;  %v779_v0 = vpop.f32.mrb[37].mxu0 }
 0x1bf   : > { %v780_v14 = vadd.f32 %v779_v0, %v3116_v3  ;;  %v781_v15 = vpop.f32.mrb[38].mxu0  ;;  %1429 = vmatprep.mubr.bf16.mxu1 %v1151_v11 }
 0x1c0   : > { %v782_v16 = vadd.f32 %v781_v15, %v3114_v2  ;;  %v783_v19 = vpop.f32.mrb[39].mxu0  ;;  %1430 = vmatmul.mubr.bf16.gmra.mrb[24].mxu1 %v1150_v10  ;;  %v1042_v21 = vmax.f32 %v778_v13, 0.0 }
 0x1c1   : > { %v784_v20 = vadd.f32 %v783_v19, %v3116_v3  ;;  %v1043_v23 = vmax.f32 %v780_v14, 0.0 }
 0x1c2   : > { %v1044_v22 = vmax.f32 %v782_v16, 0.0 }
 0x1c3   : > { %v1045_v24 = vmax.f32 %v784_v20, 0.0 }
 0x1c4   : > { %v1152_v25 = vpack.c.bf16 %v1044_v22, %v1042_v21 }
 0x1c5   : > { %v1153_v26 = vpack.c.bf16 %v1045_v24, %v1043_v23  ;;  %v787_v27 = vpop.f32.mrb[40].mxu0 }
 0x1c6   : > { %v788_v28 = vadd.f32 %v787_v27, %v3114_v2  ;;  %v789_v18 = vpop.f32.mrb[41].mxu0 }
 0x1c7   : > { %v790_v29 = vadd.f32 %v789_v18, %v3116_v3  ;;  %v791_v30 = vpop.f32.mrb[42].mxu0  ;;  %1437 = vmatprep.mubr.bf16.mxu1 %v1153_v26 }
 0x1c8   : > { %v792_v31 = vadd.f32 %v791_v30, %v3114_v2  ;;  %v793_v34 = vpop.f32.mrb[43].mxu0  ;;  %1438 = vmatmul.mubr.bf16.gmra.mrb[28].mxu1 %v1152_v25  ;;  %v1046_v36 = vmax.f32 %v788_v28, 0.0 }
 0x1c9   : > { %v794_v35 = vadd.f32 %v793_v34, %v3116_v3  ;;  %v1047_v38 = vmax.f32 %v790_v29, 0.0 }
 0x1ca   : > { %v1048_v37 = vmax.f32 %v792_v31, 0.0 }
 0x1cb   : > { %v1049_v39 = vmax.f32 %v794_v35, 0.0 }
 0x1cc   : > { %v1154_v40 = vpack.c.bf16 %v1048_v37, %v1046_v36 }
 0x1cd   : > { %v1155_v17 = vpack.c.bf16 %v1049_v39, %v1047_v38  ;;  %v797_v41 = vpop.f32.mrb[44].mxu0 }
 0x1ce   : > { %v798_v42 = vadd.f32 %v797_v41, %v3114_v2  ;;  %v799_v33 = vpop.f32.mrb[45].mxu0 }
 0x1cf   : > { %v800_v43 = vadd.f32 %v799_v33, %v3116_v3  ;;  %v801_v44 = vpop.f32.mrb[46].mxu0  ;;  %1445 = vmatprep.mubr.bf16.mxu1 %v1155_v17 }
 0x1d0   : > { %v802_v45 = vadd.f32 %v801_v44, %v3114_v2  ;;  %v803_v46 = vpop.f32.mrb[47].mxu0  ;;  %1446 = vmatmul.mubr.bf16.gmra.mrb[32].mxu1 %v1154_v40  ;;  %v1050_v48 = vmax.f32 %v798_v42, 0.0 }
 0x1d1   : > { %v804_v47 = vadd.f32 %v803_v46, %v3116_v3  ;;  %v1051_v50 = vmax.f32 %v800_v43, 0.0 }
 0x1d2   : > { %v1052_v49 = vmax.f32 %v802_v45, 0.0 }
 0x1d3   : > { %v1053_v51 = vmax.f32 %v804_v47, 0.0 }
 0x1d4   : > { %v1156_v52 = vpack.c.bf16 %v1052_v49, %v1050_v48 }
 0x1d5   : > { %v1157_v53 = vpack.c.bf16 %v1053_v51, %v1051_v50  ;;  %v807_v54 = vpop.f32.mrb[48].mxu0 }
 0x1d6   : > { %v808_v32 = vadd.f32 %v807_v54, %v3114_v2  ;;  %v809_v55 = vpop.f32.mrb[49].mxu0 }
 0x1d7   : > { %v810_v56 = vadd.f32 %v809_v55, %v3116_v3  ;;  %v811_v57 = vpop.f32.mrb[50].mxu0  ;;  %1453 = vmatprep.mubr.bf16.mxu1 %v1157_v53 }
 0x1d8   : > { %v812_v58 = vadd.f32 %v811_v57, %v3114_v2  ;;  %v813_v59 = vpop.f32.mrb[51].mxu0  ;;  %1454 = vmatmul.mubr.bf16.gmra.mrb[36].mxu1 %v1156_v52  ;;  %v1054_v61 = vmax.f32 %v808_v32, 0.0 }
 0x1d9   : > { %v814_v60 = vadd.f32 %v813_v59, %v3116_v3  ;;  %v1055_v63 = vmax.f32 %v810_v56, 0.0 }
 0x1da   : > { %v1056_v62 = vmax.f32 %v812_v58, 0.0 }
 0x1db   : > { %v1057_v1 = vmax.f32 %v814_v60, 0.0 }
 0x1dc   : > { %v1158_v4 = vpack.c.bf16 %v1056_v62, %v1054_v61 }
 0x1dd   : > { %v1159_v5 = vpack.c.bf16 %v1057_v1, %v1055_v63  ;;  %v817_v6 = vpop.f32.mrb[52].mxu0 }
 0x1de   : > { %v818_v7 = vadd.f32 %v817_v6, %v3114_v2  ;;  %v819_v8 = vpop.f32.mrb[53].mxu0 }
 0x1df   : > { %v820_v9 = vadd.f32 %v819_v8, %v3116_v3  ;;  %v821_v10 = vpop.f32.mrb[54].mxu0  ;;  %1461 = vmatprep.mubr.bf16.mxu1 %v1159_v5 }
 0x1e0   : > { %v822_v11 = vadd.f32 %v821_v10, %v3114_v2  ;;  %v823_v12 = vpop.f32.mrb[55].mxu0  ;;  %1462 = vmatmul.mubr.bf16.gmra.mrb[40].mxu1 %v1158_v4  ;;  %v1058_v0 = vmax.f32 %v818_v7, 0.0 }
 0x1e1   : > { %v824_v13 = vadd.f32 %v823_v12, %v3116_v3  ;;  %v1059_v15 = vmax.f32 %v820_v9, 0.0 }
 0x1e2   : > { %v1060_v14 = vmax.f32 %v822_v11, 0.0 }
 0x1e3   : > { %v1061_v16 = vmax.f32 %v824_v13, 0.0 }
 0x1e4   : > { %v1160_v19 = vpack.c.bf16 %v1060_v14, %v1058_v0 }
 0x1e5   : > { %v1161_v20 = vpack.c.bf16 %v1061_v16, %v1059_v15  ;;  %v827_v21 = vpop.f32.mrb[56].mxu0 }
 0x1e6   : > { %v828_v22 = vadd.f32 %v827_v21, %v3114_v2  ;;  %v829_v23 = vpop.f32.mrb[57].mxu0 }
 0x1e7   : > { %v830_v24 = vadd.f32 %v829_v23, %v3116_v3  ;;  %v831_v25 = vpop.f32.mrb[58].mxu0  ;;  %1469 = vmatprep.mubr.bf16.mxu1 %v1161_v20 }
 0x1e8   : > { %v832_v26 = vadd.f32 %v831_v25, %v3114_v2  ;;  %v833_v27 = vpop.f32.mrb[59].mxu0  ;;  %1470 = vmatmul.mubr.bf16.gmra.mrb[44].mxu1 %v1160_v19  ;;  %v1062_v18 = vmax.f32 %v828_v22, 0.0 }
 0x1e9   : > { %v834_v28 = vadd.f32 %v833_v27, %v3116_v3  ;;  %v1063_v30 = vmax.f32 %v830_v24, 0.0 }
 0x1ea   : > { %v1064_v29 = vmax.f32 %v832_v26, 0.0 }
 0x1eb   : > { %v1065_v31 = vmax.f32 %v834_v28, 0.0 }
 0x1ec   : > { %v1162_v34 = vpack.c.bf16 %v1064_v29, %v1062_v18 }
 0x1ed   : > { %v1163_v35 = vpack.c.bf16 %v1065_v31, %v1063_v30  ;;  %v837_v36 = vpop.f32.mrb[60].mxu0 }
 0x1ee   : > { %v838_v37 = vadd.f32 %v837_v36, %v3114_v2  ;;  %v839_v38 = vpop.f32.mrb[61].mxu0 }
 0x1ef   : > { %v840_v39 = vadd.f32 %v839_v38, %v3116_v3  ;;  %v841_v40 = vpop.f32.mrb[62].mxu0  ;;  %1477 = vmatprep.mubr.bf16.mxu1 %v1163_v35 }
 0x1f0   : > { %v842_v17 = vadd.f32 %v841_v40, %v3114_v2  ;;  %v843_v41 = vpop.f32.mrb[63].mxu0  ;;  %1478 = vmatmul.mubr.bf16.gmra.mrb[48].mxu1 %v1162_v34  ;;  %v1066_v33 = vmax.f32 %v838_v37, 0.0 }
 0x1f1   : > { %v844_v42 = vadd.f32 %v843_v41, %v3116_v3  ;;  %v1067_v44 = vmax.f32 %v840_v39, 0.0 }
 0x1f2   : > { %v1068_v43 = vmax.f32 %v842_v17, 0.0 }
 0x1f3   : > { %v1069_v45 = vmax.f32 %v844_v42, 0.0 }
 0x1f4   : > { %v1164_v46 = vpack.c.bf16 %v1068_v43, %v1066_v33 }
 0x1f5   : > { %v1165_v47 = vpack.c.bf16 %v1069_v45, %v1067_v44  ;;  %v847_v48 = vpop.f32.mrb[64].mxu0 }
 0x1f6   : > { %v848_v49 = vadd.f32 %v847_v48, %v3114_v2  ;;  %v849_v50 = vpop.f32.mrb[65].mxu0 }
 0x1f7   : > { %v850_v51 = vadd.f32 %v849_v50, %v3116_v3  ;;  %v851_v52 = vpop.f32.mrb[66].mxu0  ;;  %1485 = vmatprep.mubr.bf16.mxu1 %v1165_v47 }
 0x1f8   : > { %v852_v53 = vadd.f32 %v851_v52, %v3114_v2  ;;  %v853_v54 = vpop.f32.mrb[67].mxu0  ;;  %1486 = vmatmul.mubr.bf16.gmra.mrb[52].mxu1 %v1164_v46  ;;  %v1070_v55 = vmax.f32 %v848_v49, 0.0 }
 0x1f9   : > { %v854_v32 = vadd.f32 %v853_v54, %v3116_v3  ;;  %v1071_v57 = vmax.f32 %v850_v51, 0.0 }
 0x1fa   : > { %v1072_v56 = vmax.f32 %v852_v53, 0.0 }
 0x1fb   : > { %v1073_v58 = vmax.f32 %v854_v32, 0.0 }
 0x1fc   : > { %v1166_v59 = vpack.c.bf16 %v1072_v56, %v1070_v55 }
 0x1fd   : > { %v1167_v60 = vpack.c.bf16 %v1073_v58, %v1071_v57  ;;  %v857_v61 = vpop.f32.mrb[68].mxu0 }
 0x1fe   : > { %v858_v62 = vadd.f32 %v857_v61, %v3114_v2  ;;  %v859_v63 = vpop.f32.mrb[69].mxu0 }
 0x1ff   : > { %v860_v1 = vadd.f32 %v859_v63, %v3116_v3  ;;  %v861_v4 = vpop.f32.mrb[70].mxu0  ;;  %1493 = vmatprep.mubr.bf16.mxu1 %v1167_v60 }
 0x200   : > { %v862_v5 = vadd.f32 %v861_v4, %v3114_v2  ;;  %v863_v6 = vpop.f32.mrb[71].mxu0  ;;  %1494 = vmatmul.mubr.bf16.gmra.mrb[56].mxu1 %v1166_v59  ;;  %v1074_v8 = vmax.f32 %v858_v62, 0.0 }
 0x201   : > { %v864_v7 = vadd.f32 %v863_v6, %v3116_v3  ;;  %v1075_v10 = vmax.f32 %v860_v1, 0.0 }
 0x202   : > { %v1076_v9 = vmax.f32 %v862_v5, 0.0 }
 0x203   : > { %v1077_v11 = vmax.f32 %v864_v7, 0.0 }
 0x204   : > { %v1168_v12 = vpack.c.bf16 %v1076_v9, %v1074_v8 }
 0x205   : > { %v1169_v13 = vpack.c.bf16 %v1077_v11, %v1075_v10  ;;  %v867_v0 = vpop.f32.mrb[72].mxu0 }
 0x206   : > { %v868_v14 = vadd.f32 %v867_v0, %v3114_v2  ;;  %v869_v15 = vpop.f32.mrb[73].mxu0 }
 0x207   : > { %v870_v16 = vadd.f32 %v869_v15, %v3116_v3  ;;  %v871_v19 = vpop.f32.mrb[74].mxu0  ;;  %1501 = vmatprep.mubr.bf16.mxu1 %v1169_v13 }
 0x208   : > { %v872_v20 = vadd.f32 %v871_v19, %v3114_v2  ;;  %v873_v21 = vpop.f32.mrb[75].mxu0  ;;  %1502 = vmatmul.mubr.bf16.gmra.mrb[60].mxu1 %v1168_v12  ;;  %v1078_v23 = vmax.f32 %v868_v14, 0.0 }
 0x209   : > { %v874_v22 = vadd.f32 %v873_v21, %v3116_v3  ;;  %v1079_v25 = vmax.f32 %v870_v16, 0.0 }
 0x20a   : > { %v1080_v24 = vmax.f32 %v872_v20, 0.0 }
 0x20b   : > { %v1081_v26 = vmax.f32 %v874_v22, 0.0 }
 0x20c   : > { %v1170_v27 = vpack.c.bf16 %v1080_v24, %v1078_v23 }
 0x20d   : > { %v1171_v28 = vpack.c.bf16 %v1081_v26, %v1079_v25  ;;  %v877_v18 = vpop.f32.mrb[76].mxu0 }
 0x20e   : > { %v878_v29 = vadd.f32 %v877_v18, %v3114_v2  ;;  %v879_v30 = vpop.f32.mrb[77].mxu0 }
 0x20f   : > { %v880_v31 = vadd.f32 %v879_v30, %v3116_v3  ;;  %v881_v34 = vpop.f32.mrb[78].mxu0  ;;  %1509 = vmatprep.mubr.bf16.mxu1 %v1171_v28 }
 0x210   : > { %v882_v35 = vadd.f32 %v881_v34, %v3114_v2  ;;  %v883_v36 = vpop.f32.mrb[79].mxu0  ;;  %1510 = vmatmul.mubr.bf16.gmra.mrb[64].mxu1 %v1170_v27  ;;  %v1082_v38 = vmax.f32 %v878_v29, 0.0 }
 0x211   : > { %v884_v37 = vadd.f32 %v883_v36, %v3116_v3  ;;  %v1083_v40 = vmax.f32 %v880_v31, 0.0 }
 0x212   : > { %v1084_v39 = vmax.f32 %v882_v35, 0.0 }
 0x213   : > { %v1085_v17 = vmax.f32 %v884_v37, 0.0 }
 0x214   : > { %v1172_v41 = vpack.c.bf16 %v1084_v39, %v1082_v38 }
 0x215   : > { %v1173_v42 = vpack.c.bf16 %v1085_v17, %v1083_v40  ;;  %v887_v33 = vpop.f32.mrb[80].mxu0 }
 0x216   : > { %v888_v43 = vadd.f32 %v887_v33, %v3114_v2  ;;  %v889_v44 = vpop.f32.mrb[81].mxu0 }
 0x217   : > { %v890_v45 = vadd.f32 %v889_v44, %v3116_v3  ;;  %v891_v46 = vpop.f32.mrb[82].mxu0  ;;  %1517 = vmatprep.mubr.bf16.mxu1 %v1173_v42 }
 0x218   : > { %v892_v47 = vadd.f32 %v891_v46, %v3114_v2  ;;  %v893_v48 = vpop.f32.mrb[83].mxu0  ;;  %1518 = vmatmul.mubr.bf16.gmra.mrb[68].mxu1 %v1172_v41  ;;  %v1086_v50 = vmax.f32 %v888_v43, 0.0 }
 0x219   : > { %v894_v49 = vadd.f32 %v893_v48, %v3116_v3  ;;  %v1087_v52 = vmax.f32 %v890_v45, 0.0 }
 0x21a   : > { %v1088_v51 = vmax.f32 %v892_v47, 0.0 }
 0x21b   : > { %v1089_v53 = vmax.f32 %v894_v49, 0.0 }
 0x21c   : > { %v1174_v54 = vpack.c.bf16 %v1088_v51, %v1086_v50 }
 0x21d   : > { %v1175_v32 = vpack.c.bf16 %v1089_v53, %v1087_v52  ;;  %v897_v55 = vpop.f32.mrb[84].mxu0 }
 0x21e   : > { %v898_v56 = vadd.f32 %v897_v55, %v3114_v2  ;;  %v899_v57 = vpop.f32.mrb[85].mxu0 }
 0x21f   : > { %v900_v58 = vadd.f32 %v899_v57, %v3116_v3  ;;  %v901_v59 = vpop.f32.mrb[86].mxu0  ;;  %1525 = vmatprep.mubr.bf16.mxu1 %v1175_v32 }
 0x220   : > { %v902_v60 = vadd.f32 %v901_v59, %v3114_v2  ;;  %v903_v61 = vpop.f32.mrb[87].mxu0  ;;  %1526 = vmatmul.mubr.bf16.gmra.mrb[72].mxu1 %v1174_v54  ;;  %v1090_v63 = vmax.f32 %v898_v56, 0.0 }
 0x221   : > { %v904_v62 = vadd.f32 %v903_v61, %v3116_v3  ;;  %v1091_v4 = vmax.f32 %v900_v58, 0.0 }
 0x222   : > { %v1092_v1 = vmax.f32 %v902_v60, 0.0 }
 0x223   : > { %v1093_v5 = vmax.f32 %v904_v62, 0.0 }
 0x224   : > { %v1176_v6 = vpack.c.bf16 %v1092_v1, %v1090_v63 }
 0x225   : > { %v1177_v7 = vpack.c.bf16 %v1093_v5, %v1091_v4  ;;  %v907_v8 = vpop.f32.mrb[88].mxu0 }
 0x226   : > { %v908_v9 = vadd.f32 %v907_v8, %v3114_v2  ;;  %v909_v10 = vpop.f32.mrb[89].mxu0 }
 0x227   : > { %v910_v11 = vadd.f32 %v909_v10, %v3116_v3  ;;  %v911_v12 = vpop.f32.mrb[90].mxu0  ;;  %1533 = vmatprep.mubr.bf16.mxu1 %v1177_v7 }
 0x228   : > { %v912_v13 = vadd.f32 %v911_v12, %v3114_v2  ;;  %v913_v0 = vpop.f32.mrb[91].mxu0  ;;  %1534 = vmatmul.mubr.bf16.gmra.mrb[76].mxu1 %v1176_v6  ;;  %v1094_v15 = vmax.f32 %v908_v9, 0.0 }
 0x229   : > { %v914_v14 = vadd.f32 %v913_v0, %v3116_v3  ;;  %v1095_v19 = vmax.f32 %v910_v11, 0.0 }
 0x22a   : > { %v1096_v16 = vmax.f32 %v912_v13, 0.0 }
 0x22b   : > { %v1097_v20 = vmax.f32 %v914_v14, 0.0 }
 0x22c   : > { %v1178_v21 = vpack.c.bf16 %v1096_v16, %v1094_v15 }
 0x22d   : > { %v1179_v22 = vpack.c.bf16 %v1097_v20, %v1095_v19  ;;  %v917_v23 = vpop.f32.mrb[92].mxu0 }
 0x22e   : > { %v918_v24 = vadd.f32 %v917_v23, %v3114_v2  ;;  %v919_v25 = vpop.f32.mrb[93].mxu0 }
 0x22f   : > { %v920_v26 = vadd.f32 %v919_v25, %v3116_v3  ;;  %v921_v27 = vpop.f32.mrb[94].mxu0  ;;  %1541 = vmatprep.mubr.bf16.mxu1 %v1179_v22 }
 0x230   : > { %v922_v28 = vadd.f32 %v921_v27, %v3114_v2  ;;  %v923_v18 = vpop.f32.mrb[95].mxu0  ;;  %1542 = vmatmul.mubr.bf16.gmra.mrb[80].mxu1 %v1178_v21  ;;  %v1098_v30 = vmax.f32 %v918_v24, 0.0 }
 0x231   : > { %v924_v29 = vadd.f32 %v923_v18, %v3116_v3  ;;  %v1099_v34 = vmax.f32 %v920_v26, 0.0 }
 0x232   : > { %v1100_v31 = vmax.f32 %v922_v28, 0.0 }
 0x233   : > { %v1101_v35 = vmax.f32 %v924_v29, 0.0 }
 0x234   : > { %v1180_v36 = vpack.c.bf16 %v1100_v31, %v1098_v30 }
 0x235   : > { %v1181_v37 = vpack.c.bf16 %v1101_v35, %v1099_v34  ;;  %v927_v38 = vpop.f32.mrb[96].mxu0 }
 0x236   : > { %v928_v39 = vadd.f32 %v927_v38, %v3114_v2  ;;  %v929_v40 = vpop.f32.mrb[97].mxu0 }
 0x237   : > { %v930_v17 = vadd.f32 %v929_v40, %v3116_v3  ;;  %v931_v41 = vpop.f32.mrb[98].mxu0  ;;  %1549 = vmatprep.mubr.bf16.mxu1 %v1181_v37 }
 0x238   : > { %v932_v42 = vadd.f32 %v931_v41, %v3114_v2  ;;  %v933_v33 = vpop.f32.mrb[99].mxu0  ;;  %1550 = vmatmul.mubr.bf16.gmra.mrb[84].mxu1 %v1180_v36  ;;  %v1102_v44 = vmax.f32 %v928_v39, 0.0 }
 0x239   : > { %v934_v43 = vadd.f32 %v933_v33, %v3116_v3  ;;  %v1103_v46 = vmax.f32 %v930_v17, 0.0 }
 0x23a   : > { %v1104_v45 = vmax.f32 %v932_v42, 0.0 }
 0x23b   : > { %v1105_v47 = vmax.f32 %v934_v43, 0.0 }
 0x23c   : > { %v1182_v48 = vpack.c.bf16 %v1104_v45, %v1102_v44 }
 0x23d   : > { %v1183_v49 = vpack.c.bf16 %v1105_v47, %v1103_v46  ;;  %v937_v50 = vpop.f32.mrb[100].mxu0 }
 0x23e   : > { %v938_v51 = vadd.f32 %v937_v50, %v3114_v2  ;;  %v939_v52 = vpop.f32.mrb[101].mxu0 }
 0x23f   : > { %v940_v53 = vadd.f32 %v939_v52, %v3116_v3  ;;  %v941_v54 = vpop.f32.mrb[102].mxu0  ;;  %1557 = vmatprep.mubr.bf16.mxu1 %v1183_v49 }
 0x240   : > { %v942_v32 = vadd.f32 %v941_v54, %v3114_v2  ;;  %v943_v55 = vpop.f32.mrb[103].mxu0  ;;  %1558 = vmatmul.mubr.bf16.gmra.mrb[88].mxu1 %v1182_v48  ;;  %v1106_v57 = vmax.f32 %v938_v51, 0.0 }
 0x241   : > { %v944_v56 = vadd.f32 %v943_v55, %v3116_v3  ;;  %v1107_v59 = vmax.f32 %v940_v53, 0.0  ;;  %v3263_v55 = vld [vmem:[%s3440_s4] ss:$0 sm:$0xff] }
 0x242   : > { %v1108_v58 = vmax.f32 %v942_v32, 0.0 }
 0x243   : > { %v1109_v60 = vmax.f32 %v944_v56, 0.0 }
 0x244   : > { %v1184_v61 = vpack.c.bf16 %v1108_v58, %v1106_v57 }
 0x245   : > { %v1185_v62 = vpack.c.bf16 %v1109_v60, %v1107_v59  ;;  %v947_v63 = vpop.f32.mrb[104].mxu0 }
 0x246   : > { %v948_v1 = vadd.f32 %v947_v63, %v3114_v2  ;;  %v949_v4 = vpop.f32.mrb[105].mxu0 }
 0x247   : > { %v950_v5 = vadd.f32 %v949_v4, %v3116_v3  ;;  %v951_v6 = vpop.f32.mrb[106].mxu0  ;;  %1565 = vmatprep.mubr.bf16.mxu1 %v1185_v62 }
 0x248   : > { %v952_v7 = vadd.f32 %v951_v6, %v3114_v2  ;;  %v953_v8 = vpop.f32.mrb[107].mxu0  ;;  %1566 = vmatmul.mubr.bf16.gmra.mrb[92].mxu1 %v1184_v61  ;;  %v1110_v10 = vmax.f32 %v948_v1, 0.0 }
 0x249   : > { %v954_v9 = vadd.f32 %v953_v8, %v3116_v3  ;;  %v1111_v12 = vmax.f32 %v950_v5, 0.0 }
 0x24a   : > { %v1112_v11 = vmax.f32 %v952_v7, 0.0 }
 0x24b   : > { %v1113_v13 = vmax.f32 %v954_v9, 0.0 }
 0x24c   : > { %v1186_v0 = vpack.c.bf16 %v1112_v11, %v1110_v10 }
 0x24d   : > { %v1187_v14 = vpack.c.bf16 %v1113_v13, %v1111_v12  ;;  %v957_v15 = vpop.f32.mrb[108].mxu0 }
 0x24e   : > { %v958_v16 = vadd.f32 %v957_v15, %v3114_v2  ;;  %v959_v19 = vpop.f32.mrb[109].mxu0 }
 0x24f   : > { %v960_v20 = vadd.f32 %v959_v19, %v3116_v3  ;;  %v961_v21 = vpop.f32.mrb[110].mxu0  ;;  %1573 = vmatprep.mubr.bf16.mxu1 %v1187_v14 }
 0x250   : > { %v962_v22 = vadd.f32 %v961_v21, %v3114_v2  ;;  %v963_v23 = vpop.f32.mrb[111].mxu0  ;;  %1574 = vmatmul.mubr.bf16.gmra.mrb[96].mxu1 %v1186_v0  ;;  %v1114_v25 = vmax.f32 %v958_v16, 0.0 }
 0x251   : > { %v964_v24 = vadd.f32 %v963_v23, %v3116_v3  ;;  %v1115_v27 = vmax.f32 %v960_v20, 0.0 }
 0x252   : > { %v1116_v26 = vmax.f32 %v962_v22, 0.0 }
 0x253   : > { %v1117_v28 = vmax.f32 %v964_v24, 0.0 }
 0x254   : > { %v1188_v18 = vpack.c.bf16 %v1116_v26, %v1114_v25 }
 0x255   : > { %v1189_v29 = vpack.c.bf16 %v1117_v28, %v1115_v27  ;;  %v967_v30 = vpop.f32.mrb[112].mxu0 }
 0x256   : > { %v968_v31 = vadd.f32 %v967_v30, %v3114_v2  ;;  %v969_v34 = vpop.f32.mrb[113].mxu0 }
 0x257   : > { %v970_v35 = vadd.f32 %v969_v34, %v3116_v3  ;;  %v971_v36 = vpop.f32.mrb[114].mxu0  ;;  %1581 = vmatprep.mubr.bf16.mxu1 %v1189_v29 }
 0x258   : > { %v972_v37 = vadd.f32 %v971_v36, %v3114_v2  ;;  %v973_v38 = vpop.f32.mrb[115].mxu0  ;;  %1582 = vmatmul.mubr.bf16.gmra.mrb[100].mxu1 %v1188_v18  ;;  %v1118_v40 = vmax.f32 %v968_v31, 0.0 }
 0x259   : > { %v974_v39 = vadd.f32 %v973_v38, %v3116_v3  ;;  %v1119_v41 = vmax.f32 %v970_v35, 0.0 }
 0x25a   : > { %v1120_v17 = vmax.f32 %v972_v37, 0.0 }
 0x25b   : > { %v1121_v42 = vmax.f32 %v974_v39, 0.0 }
 0x25c   : > { %v1190_v33 = vpack.c.bf16 %v1120_v17, %v1118_v40 }
 0x25d   : > { %v1191_v43 = vpack.c.bf16 %v1121_v42, %v1119_v41  ;;  %v977_v44 = vpop.f32.mrb[116].mxu0 }
 0x25e   : > { %v978_v45 = vadd.f32 %v977_v44, %v3114_v2  ;;  %v979_v46 = vpop.f32.mrb[117].mxu0 }
 0x25f   : > { %v980_v47 = vadd.f32 %v979_v46, %v3116_v3  ;;  %v981_v48 = vpop.f32.mrb[118].mxu0  ;;  %1589 = vmatprep.mubr.bf16.mxu1 %v1191_v43 }
 0x260   : > { %v982_v49 = vadd.f32 %v981_v48, %v3114_v2  ;;  %v983_v50 = vpop.f32.mrb[119].mxu0  ;;  %1590 = vmatmul.mubr.bf16.gmra.mrb[104].mxu1 %v1190_v33  ;;  %v1122_v52 = vmax.f32 %v978_v45, 0.0 }
 0x261   : > { %v984_v51 = vadd.f32 %v983_v50, %v3116_v3  ;;  %v1123_v54 = vmax.f32 %v980_v47, 0.0 }
 0x262   : > { %v1124_v53 = vmax.f32 %v982_v49, 0.0 }
 0x263   : > { %v1125_v32 = vmax.f32 %v984_v51, 0.0  ;;  %v1383_v56 = vpop.f32.mrb[0].mxu1 }
 0x264   : > { %v1192_v57 = vpack.c.bf16 %v1124_v53, %v1122_v52  ;;  %v1385_v58 = vpop.f32.mrb[1].mxu1  ;;  %v1384_v62 = vadd.f32 %v3263_v55, %v1383_v56 }
 0x265   : > { %v1193_v59 = vpack.c.bf16 %v1125_v32, %v1123_v54  ;;  %v987_v60 = vpop.f32.mrb[120].mxu0  ;;  %v1386_v61 = vpop.f32.mrb[2].mxu1 }
 0x266   : > { %v988_v63 = vadd.f32 %v987_v60, %v3114_v2  ;;  %v1387_v1 = vadd.f32 %v3263_v55, %v1386_v61  ;;  %v989_v4 = vpop.f32.mrb[121].mxu0  ;;  %v1388_v5 = vpop.f32.mrb[3].mxu1 }
 0x267   : > { %v990_v6 = vadd.f32 %v989_v4, %v3116_v3  ;;  %v991_v7 = vpop.f32.mrb[122].mxu0  ;;  %1597 = vmatprep.mubr.bf16.mxu1 %v1193_v59 }
 0x268   : > { %v2288_v8 = vpack.c.bf16 %v1387_v1, %v1384_v62  ;;  %v992_v9 = vadd.f32 %v991_v7, %v3114_v2  ;;  %v993_v10 = vpop.f32.mrb[123].mxu0  ;;  %1598 = vmatmul.mubr.bf16.gmra.mrb[108].mxu1 %v1192_v57  ;;  %v1126_v12 = vmax.f32 %v988_v63, 0.0 }
 0x269   : > { %v994_v11 = vadd.f32 %v993_v10, %v3116_v3  ;;  %v1127_v0 = vmax.f32 %v990_v6, 0.0 }
 0x26a   : > { %2436 = vst [vmem:[%s3273_s27 + $0x10] sm:$0xff] %v2288_v8   ;;  %v1128_v13 = vmax.f32 %v992_v9, 0.0 }
 0x26b   : > { %v1129_v14 = vmax.f32 %v994_v11, 0.0  ;;  %v1391_v15 = vpop.f32.mrb[4].mxu1 }
 0x26c   : > { %v1194_v16 = vpack.c.bf16 %v1128_v13, %v1126_v12  ;;  %v1393_v19 = vpop.f32.mrb[5].mxu1  ;;  %v1392_v23 = vadd.f32 %v3263_v55, %v1391_v15 }
 0x26d   : > { %v1195_v20 = vpack.c.bf16 %v1129_v14, %v1127_v0  ;;  %v997_v21 = vpop.f32.mrb[124].mxu0  ;;  %v1394_v22 = vpop.f32.mrb[6].mxu1 }
 0x26e   : > { %v998_v24 = vadd.f32 %v997_v21, %v3114_v2  ;;  %v1395_v25 = vadd.f32 %v3263_v55, %v1394_v22  ;;  %v999_v26 = vpop.f32.mrb[125].mxu0  ;;  %v1396_v27 = vpop.f32.mrb[7].mxu1 }
 0x26f   : > { %v1000_v28 = vadd.f32 %v999_v26, %v3116_v3  ;;  %v1001_v18 = vpop.f32.mrb[126].mxu0  ;;  %1605 = vmatprep.mubr.bf16.mxu1 %v1195_v20 }
 0x270   : > { %v2293_v29 = vpack.c.bf16 %v1395_v25, %v1392_v23  ;;  %v1002_v30 = vadd.f32 %v1001_v18, %v3114_v2  ;;  %v1003_v31 = vpop.f32.mrb[127].mxu0  ;;  %1606 = vmatmul.mubr.bf16.gmra.mrb[112].mxu1 %v1194_v16  ;;  %v1130_v35 = vmax.f32 %v998_v24, 0.0 }
 0x271   : > { %v1004_v34 = vadd.f32 %v1003_v31, %v3116_v3  ;;  %v1131_v37 = vmax.f32 %v1000_v28, 0.0 }
 0x272   : > { %2437 = vst [vmem:[%s3273_s27 + $0x18] sm:$0xff] %v2293_v29   ;;  %v1132_v36 = vmax.f32 %v1002_v30, 0.0 }
 0x273   : > { %v1133_v38 = vmax.f32 %v1004_v34, 0.0  ;;  %v1399_v39 = vpop.f32.mrb[8].mxu1 }
 0x274   : > { %v1196_v40 = vpack.c.bf16 %v1132_v36, %v1130_v35  ;;  %v1401_v17 = vpop.f32.mrb[9].mxu1  ;;  %v1400_v43 = vadd.f32 %v3263_v55, %v1399_v39 }
 0x275   : > { %v1197_v41 = vpack.c.bf16 %v1133_v38, %v1131_v37  ;;  %v1367_v42 = vpop.f32.mrb[128].mxu0  ;;  %v1402_v33 = vpop.f32.mrb[10].mxu1 }
 0x276   : > { %v1403_v2 = vadd.f32 %v3263_v55, %v1402_v33  ;;  %v1369_v44 = vpop.f32.mrb[129].mxu0  ;;  %v1404_v45 = vpop.f32.mrb[11].mxu1  ;;  %v1368_v46 = vadd.f32 %v3263_v55, %v1367_v42 }
 0x277   : > { %v1370_v3 = vpop.f32.mrb[130].mxu0  ;;  %1613 = vmatprep.mubr.bf16.mxu1 %v1197_v41 }
 0x278   : > { %v2298_v47 = vpack.c.bf16 %v1403_v2, %v1400_v43  ;;  %v1371_v48 = vadd.f32 %v3263_v55, %v1370_v3  ;;  %v1372_v49 = vpop.f32.mrb[131].mxu0  ;;  %1614 = vmatmul.mubr.bf16.gmra.mrb[116].mxu1 %v1196_v40 }
 0x27a   : > { %2438 = vst [vmem:[%s3273_s27 + $0x20] sm:$0xff] %v2298_v47   ;;  %v2278_v50 = vpack.c.bf16 %v1371_v48, %v1368_v46 }
 0x27b   : > { %v1407_v51 = vpop.f32.mrb[12].mxu1 }
 0x27c   : > { %2279 = vst [vmem:[%s3273_s27] sm:$0xff] %v2278_v50   ;;  %v1409_v52 = vpop.f32.mrb[13].mxu1  ;;  %v1408_v32 = vadd.f32 %v3263_v55, %v1407_v51 }
 0x27d   : > { %v1375_v53 = vpop.f32.mrb[132].mxu0  ;;  %v1410_v54 = vpop.f32.mrb[14].mxu1 }
 0x27e   : > { %v1411_v56 = vadd.f32 %v3263_v55, %v1410_v54  ;;  %v1377_v57 = vpop.f32.mrb[133].mxu0  ;;  %v1412_v58 = vpop.f32.mrb[15].mxu1  ;;  %v1376_v60 = vadd.f32 %v3263_v55, %v1375_v53 }
 0x27f   : > { %v1378_v59 = vpop.f32.mrb[134].mxu0 }
 0x280   : > { %v2303_v61 = vpack.c.bf16 %v1411_v56, %v1408_v32  ;;  %v1379_v62 = vadd.f32 %v3263_v55, %v1378_v59  ;;  %v1380_v63 = vpop.f32.mrb[135].mxu0 }
 0x282   : > { %2439 = vst [vmem:[%s3273_s27 + $0x28] sm:$0xff] %v2303_v61   ;;  %v2283_v1 = vpack.c.bf16 %v1379_v62, %v1376_v60 }
 0x283   : > { %v1415_v4 = vpop.f32.mrb[16].mxu1 }
 0x284   : > { %2435 = vst [vmem:[%s3273_s27 + $0x8] sm:$0xff] %v2283_v1   ;;  %v1417_v5 = vpop.f32.mrb[17].mxu1  ;;  %v1416_v7 = vadd.f32 %v3263_v55, %v1415_v4 }
 0x285   : > { %v1418_v6 = vpop.f32.mrb[18].mxu1 }
 0x286   : > { %v1419_v8 = vadd.f32 %v3263_v55, %v1418_v6  ;;  %v1420_v9 = vpop.f32.mrb[19].mxu1 }
 0x288   : > { %v2308_v10 = vpack.c.bf16 %v1419_v8, %v1416_v7 }
 0x28a   : > { %2440 = vst [vmem:[%s3273_s27 + $0x30] sm:$0xff] %v2308_v10  }
 0x28b   : > { %v1423_v11 = vpop.f32.mrb[20].mxu1 }
 0x28c   : > { %v1425_v12 = vpop.f32.mrb[21].mxu1  ;;  %v1424_v0 = vadd.f32 %v3263_v55, %v1423_v11 }
 0x28d   : > { %v1426_v13 = vpop.f32.mrb[22].mxu1 }
 0x28e   : > { %v1427_v14 = vadd.f32 %v3263_v55, %v1426_v13  ;;  %v1428_v15 = vpop.f32.mrb[23].mxu1 }
 0x290   : > { %v2313_v16 = vpack.c.bf16 %v1427_v14, %v1424_v0 }
 0x292   : > { %2441 = vst [vmem:[%s3273_s27 + $0x38] sm:$0xff] %v2313_v16  }
 0x293   : > { %v1431_v19 = vpop.f32.mrb[24].mxu1 }
 0x294   : > { %v1433_v20 = vpop.f32.mrb[25].mxu1  ;;  %v1432_v22 = vadd.f32 %v3263_v55, %v1431_v19 }
 0x295   : > { %v1434_v21 = vpop.f32.mrb[26].mxu1 }
 0x296   : > { %v1435_v23 = vadd.f32 %v3263_v55, %v1434_v21  ;;  %v1436_v24 = vpop.f32.mrb[27].mxu1 }
 0x298   : > { %v2318_v25 = vpack.c.bf16 %v1435_v23, %v1432_v22 }
 0x29a   : > { %2442 = vst [vmem:[%s3273_s27 + $0x40] sm:$0xff] %v2318_v25  }
 0x29b   : > { %v1439_v26 = vpop.f32.mrb[28].mxu1 }
 0x29c   : > { %v1441_v27 = vpop.f32.mrb[29].mxu1  ;;  %v1440_v18 = vadd.f32 %v3263_v55, %v1439_v26 }
 0x29d   : > { %v1442_v28 = vpop.f32.mrb[30].mxu1 }
 0x29e   : > { %v1443_v29 = vadd.f32 %v3263_v55, %v1442_v28  ;;  %v1444_v30 = vpop.f32.mrb[31].mxu1 }
 0x2a0   : > { %v2323_v31 = vpack.c.bf16 %v1443_v29, %v1440_v18 }
 0x2a2   : > { %2443 = vst [vmem:[%s3273_s27 + $0x48] sm:$0xff] %v2323_v31  }
 0x2a3   : > { %v1447_v34 = vpop.f32.mrb[32].mxu1 }
 0x2a4   : > { %v1449_v35 = vpop.f32.mrb[33].mxu1  ;;  %v1448_v37 = vadd.f32 %v3263_v55, %v1447_v34 }
 0x2a5   : > { %v1450_v36 = vpop.f32.mrb[34].mxu1 }
 0x2a6   : > { %v1451_v38 = vadd.f32 %v3263_v55, %v1450_v36  ;;  %v1452_v39 = vpop.f32.mrb[35].mxu1 }
 0x2a8   : > { %v2328_v40 = vpack.c.bf16 %v1451_v38, %v1448_v37 }
 0x2aa   : > { %2444 = vst [vmem:[%s3273_s27 + $0x50] sm:$0xff] %v2328_v40  }
 0x2ab   : > { %v1455_v17 = vpop.f32.mrb[36].mxu1 }
 0x2ac   : > { %v1457_v41 = vpop.f32.mrb[37].mxu1  ;;  %v1456_v33 = vadd.f32 %v3263_v55, %v1455_v17 }
 0x2ad   : > { %v1458_v42 = vpop.f32.mrb[38].mxu1 }
 0x2ae   : > { %v1459_v43 = vadd.f32 %v3263_v55, %v1458_v42  ;;  %v1460_v2 = vpop.f32.mrb[39].mxu1 }
 0x2b0   : > { %v2333_v44 = vpack.c.bf16 %v1459_v43, %v1456_v33 }
 0x2b2   : > { %2445 = vst [vmem:[%s3273_s27 + $0x58] sm:$0xff] %v2333_v44  }
 0x2b3   : > { %v1463_v45 = vpop.f32.mrb[40].mxu1 }
 0x2b4   : > { %v1465_v3 = vpop.f32.mrb[41].mxu1  ;;  %v1464_v47 = vadd.f32 %v3263_v55, %v1463_v45 }
 0x2b5   : > { %v1466_v46 = vpop.f32.mrb[42].mxu1 }
 0x2b6   : > { %v1467_v48 = vadd.f32 %v3263_v55, %v1466_v46  ;;  %v1468_v49 = vpop.f32.mrb[43].mxu1 }
 0x2b8   : > { %v2338_v50 = vpack.c.bf16 %v1467_v48, %v1464_v47 }
 0x2ba   : > { %2446 = vst [vmem:[%s3273_s27 + $0x60] sm:$0xff] %v2338_v50  }
 0x2bb   : > { %v1471_v51 = vpop.f32.mrb[44].mxu1 }
 0x2bc   : > { %v1473_v52 = vpop.f32.mrb[45].mxu1  ;;  %v1472_v54 = vadd.f32 %v3263_v55, %v1471_v51 }
 0x2bd   : > { %v1474_v53 = vpop.f32.mrb[46].mxu1 }
 0x2be   : > { %v1475_v32 = vadd.f32 %v3263_v55, %v1474_v53  ;;  %v1476_v56 = vpop.f32.mrb[47].mxu1 }
 0x2c0   : > { %v2343_v57 = vpack.c.bf16 %v1475_v32, %v1472_v54 }
 0x2c2   : > { %2447 = vst [vmem:[%s3273_s27 + $0x68] sm:$0xff] %v2343_v57  }
 0x2c3   : > { %v1479_v58 = vpop.f32.mrb[48].mxu1 }
 0x2c4   : > { %v1481_v59 = vpop.f32.mrb[49].mxu1  ;;  %v1480_v61 = vadd.f32 %v3263_v55, %v1479_v58 }
 0x2c5   : > { %v1482_v60 = vpop.f32.mrb[50].mxu1 }
 0x2c6   : > { %v1483_v62 = vadd.f32 %v3263_v55, %v1482_v60  ;;  %v1484_v63 = vpop.f32.mrb[51].mxu1 }
 0x2c8   : > { %v2348_v1 = vpack.c.bf16 %v1483_v62, %v1480_v61 }
 0x2ca   : > { %2448 = vst [vmem:[%s3273_s27 + $0x70] sm:$0xff] %v2348_v1  }
 0x2cb   : > { %v1487_v4 = vpop.f32.mrb[52].mxu1 }
 0x2cc   : > { %v1489_v5 = vpop.f32.mrb[53].mxu1  ;;  %v1488_v7 = vadd.f32 %v3263_v55, %v1487_v4 }
 0x2cd   : > { %v1490_v6 = vpop.f32.mrb[54].mxu1 }
 0x2ce   : > { %v1491_v8 = vadd.f32 %v3263_v55, %v1490_v6  ;;  %v1492_v9 = vpop.f32.mrb[55].mxu1 }
 0x2d0   : > { %v2353_v10 = vpack.c.bf16 %v1491_v8, %v1488_v7 }
 0x2d2   : > { %2449 = vst [vmem:[%s3273_s27 + $0x78] sm:$0xff] %v2353_v10  }
 0x2d3   : > { %v1495_v11 = vpop.f32.mrb[56].mxu1 }
 0x2d4   : > { %v1497_v12 = vpop.f32.mrb[57].mxu1  ;;  %v1496_v0 = vadd.f32 %v3263_v55, %v1495_v11 }
 0x2d5   : > { %v1498_v13 = vpop.f32.mrb[58].mxu1 }
 0x2d6   : > { %v1499_v14 = vadd.f32 %v3263_v55, %v1498_v13  ;;  %v1500_v15 = vpop.f32.mrb[59].mxu1 }
 0x2d8   : > { %v2358_v16 = vpack.c.bf16 %v1499_v14, %v1496_v0 }
 0x2da   : > { %2450 = vst [vmem:[%s3273_s27 + $0x80] sm:$0xff] %v2358_v16  }
 0x2db   : > { %v1503_v19 = vpop.f32.mrb[60].mxu1 }
 0x2dc   : > { %v1505_v20 = vpop.f32.mrb[61].mxu1  ;;  %v1504_v22 = vadd.f32 %v3263_v55, %v1503_v19 }
 0x2dd   : > { %v1506_v21 = vpop.f32.mrb[62].mxu1 }
 0x2de   : > { %v1507_v23 = vadd.f32 %v3263_v55, %v1506_v21  ;;  %v1508_v24 = vpop.f32.mrb[63].mxu1 }
 0x2e0   : > { %v2363_v25 = vpack.c.bf16 %v1507_v23, %v1504_v22 }
 0x2e2   : > { %2451 = vst [vmem:[%s3273_s27 + $0x88] sm:$0xff] %v2363_v25  }
 0x2e3   : > { %v1511_v26 = vpop.f32.mrb[64].mxu1 }
 0x2e4   : > { %v1513_v27 = vpop.f32.mrb[65].mxu1  ;;  %v1512_v18 = vadd.f32 %v3263_v55, %v1511_v26 }
 0x2e5   : > { %v1514_v28 = vpop.f32.mrb[66].mxu1 }
 0x2e6   : > { %v1515_v29 = vadd.f32 %v3263_v55, %v1514_v28  ;;  %v1516_v30 = vpop.f32.mrb[67].mxu1 }
 0x2e8   : > { %v2368_v31 = vpack.c.bf16 %v1515_v29, %v1512_v18 }
 0x2ea   : > { %2452 = vst [vmem:[%s3273_s27 + $0x90] sm:$0xff] %v2368_v31  }
 0x2eb   : > { %v1519_v34 = vpop.f32.mrb[68].mxu1 }
 0x2ec   : > { %v1521_v35 = vpop.f32.mrb[69].mxu1  ;;  %v1520_v37 = vadd.f32 %v3263_v55, %v1519_v34 }
 0x2ed   : > { %v1522_v36 = vpop.f32.mrb[70].mxu1 }
 0x2ee   : > { %v1523_v38 = vadd.f32 %v3263_v55, %v1522_v36  ;;  %v1524_v39 = vpop.f32.mrb[71].mxu1 }
 0x2f0   : > { %v2373_v40 = vpack.c.bf16 %v1523_v38, %v1520_v37 }
 0x2f2   : > { %2453 = vst [vmem:[%s3273_s27 + $0x98] sm:$0xff] %v2373_v40  }
 0x2f3   : > { %v1527_v17 = vpop.f32.mrb[72].mxu1 }
 0x2f4   : > { %v1529_v41 = vpop.f32.mrb[73].mxu1  ;;  %v1528_v33 = vadd.f32 %v3263_v55, %v1527_v17 }
 0x2f5   : > { %v1530_v42 = vpop.f32.mrb[74].mxu1 }
 0x2f6   : > { %v1531_v43 = vadd.f32 %v3263_v55, %v1530_v42  ;;  %v1532_v2 = vpop.f32.mrb[75].mxu1 }
 0x2f8   : > { %v2378_v44 = vpack.c.bf16 %v1531_v43, %v1528_v33 }
 0x2fa   : > { %2454 = vst [vmem:[%s3273_s27 + $0xa0] sm:$0xff] %v2378_v44  }
 0x2fb   : > { %v1535_v45 = vpop.f32.mrb[76].mxu1 }
 0x2fc   : > { %v1537_v3 = vpop.f32.mrb[77].mxu1  ;;  %v1536_v47 = vadd.f32 %v3263_v55, %v1535_v45 }
 0x2fd   : > { %v1538_v46 = vpop.f32.mrb[78].mxu1 }
 0x2fe   : > { %v1539_v48 = vadd.f32 %v3263_v55, %v1538_v46  ;;  %v1540_v49 = vpop.f32.mrb[79].mxu1 }
 0x300   : > { %v2383_v50 = vpack.c.bf16 %v1539_v48, %v1536_v47 }
 0x302   : > { %2455 = vst [vmem:[%s3273_s27 + $0xa8] sm:$0xff] %v2383_v50  }
 0x303   : > { %v1543_v51 = vpop.f32.mrb[80].mxu1 }
 0x304   : > { %v1545_v52 = vpop.f32.mrb[81].mxu1  ;;  %v1544_v54 = vadd.f32 %v3263_v55, %v1543_v51 }
 0x305   : > { %v1546_v53 = vpop.f32.mrb[82].mxu1 }
 0x306   : > { %v1547_v32 = vadd.f32 %v3263_v55, %v1546_v53  ;;  %v1548_v56 = vpop.f32.mrb[83].mxu1 }
 0x308   : > { %v2388_v57 = vpack.c.bf16 %v1547_v32, %v1544_v54 }
 0x30a   : > { %2456 = vst [vmem:[%s3273_s27 + $0xb0] sm:$0xff] %v2388_v57  }
 0x30b   : > { %v1551_v58 = vpop.f32.mrb[84].mxu1 }
 0x30c   : > { %v1553_v59 = vpop.f32.mrb[85].mxu1  ;;  %v1552_v61 = vadd.f32 %v3263_v55, %v1551_v58 }
 0x30d   : > { %v1554_v60 = vpop.f32.mrb[86].mxu1 }
 0x30e   : > { %v1555_v62 = vadd.f32 %v3263_v55, %v1554_v60  ;;  %v1556_v63 = vpop.f32.mrb[87].mxu1 }
 0x310   : > { %v2393_v1 = vpack.c.bf16 %v1555_v62, %v1552_v61 }
 0x312   : > { %2457 = vst [vmem:[%s3273_s27 + $0xb8] sm:$0xff] %v2393_v1  }
 0x313   : > { %v1559_v4 = vpop.f32.mrb[88].mxu1 }
 0x314   : > { %v1561_v5 = vpop.f32.mrb[89].mxu1  ;;  %v1560_v7 = vadd.f32 %v3263_v55, %v1559_v4 }
 0x315   : > { %v1562_v6 = vpop.f32.mrb[90].mxu1 }
 0x316   : > { %v1563_v8 = vadd.f32 %v3263_v55, %v1562_v6  ;;  %v1564_v9 = vpop.f32.mrb[91].mxu1 }
 0x318   : > { %v2398_v10 = vpack.c.bf16 %v1563_v8, %v1560_v7 }
 0x31a   : > { %2458 = vst [vmem:[%s3273_s27 + $0xc0] sm:$0xff] %v2398_v10  }
 0x31b   : > { %v1567_v11 = vpop.f32.mrb[92].mxu1 }
 0x31c   : > { %v1569_v12 = vpop.f32.mrb[93].mxu1  ;;  %v1568_v0 = vadd.f32 %v3263_v55, %v1567_v11 }
 0x31d   : > { %v1570_v13 = vpop.f32.mrb[94].mxu1 }
 0x31e   : > { %v1571_v14 = vadd.f32 %v3263_v55, %v1570_v13  ;;  %v1572_v15 = vpop.f32.mrb[95].mxu1 }
 0x320   : > { %v2403_v16 = vpack.c.bf16 %v1571_v14, %v1568_v0 }
 0x322   : > { %2459 = vst [vmem:[%s3273_s27 + $0xc8] sm:$0xff] %v2403_v16  }
 0x323   : > { %v1575_v19 = vpop.f32.mrb[96].mxu1 }
 0x324   : > { %v1577_v20 = vpop.f32.mrb[97].mxu1  ;;  %v1576_v22 = vadd.f32 %v3263_v55, %v1575_v19 }
 0x325   : > { %v1578_v21 = vpop.f32.mrb[98].mxu1 }
 0x326   : > { %v1579_v23 = vadd.f32 %v3263_v55, %v1578_v21  ;;  %v1580_v24 = vpop.f32.mrb[99].mxu1 }
 0x328   : > { %v2408_v25 = vpack.c.bf16 %v1579_v23, %v1576_v22 }
 0x32a   : > { %2460 = vst [vmem:[%s3273_s27 + $0xd0] sm:$0xff] %v2408_v25  }
 0x32b   : > { %v1583_v26 = vpop.f32.mrb[100].mxu1 }
 0x32c   : > { %v1585_v27 = vpop.f32.mrb[101].mxu1  ;;  %v1584_v18 = vadd.f32 %v3263_v55, %v1583_v26 }
 0x32d   : > { %v1586_v28 = vpop.f32.mrb[102].mxu1 }
 0x32e   : > { %v1587_v29 = vadd.f32 %v3263_v55, %v1586_v28  ;;  %v1588_v30 = vpop.f32.mrb[103].mxu1 }
 0x330   : > { %v2413_v31 = vpack.c.bf16 %v1587_v29, %v1584_v18 }
 0x332   : > { %2461 = vst [vmem:[%s3273_s27 + $0xd8] sm:$0xff] %v2413_v31  }
 0x333   : > { %v1591_v34 = vpop.f32.mrb[104].mxu1 }
 0x334   : > { %v1593_v35 = vpop.f32.mrb[105].mxu1  ;;  %v1592_v37 = vadd.f32 %v3263_v55, %v1591_v34 }
 0x335   : > { %v1594_v36 = vpop.f32.mrb[106].mxu1 }
 0x336   : > { %v1595_v38 = vadd.f32 %v3263_v55, %v1594_v36  ;;  %v1596_v39 = vpop.f32.mrb[107].mxu1 }
 0x338   : > { %v2418_v40 = vpack.c.bf16 %v1595_v38, %v1592_v37 }
 0x33a   : > { %2462 = vst [vmem:[%s3273_s27 + $0xe0] sm:$0xff] %v2418_v40  }
 0x33b   : > { %v1599_v17 = vpop.f32.mrb[108].mxu1 }
 0x33c   : > { %v1601_v41 = vpop.f32.mrb[109].mxu1  ;;  %v1600_v33 = vadd.f32 %v3263_v55, %v1599_v17 }
 0x33d   : > { %v1602_v42 = vpop.f32.mrb[110].mxu1 }
 0x33e   : > { %v1603_v43 = vadd.f32 %v3263_v55, %v1602_v42  ;;  %v1604_v2 = vpop.f32.mrb[111].mxu1 }
 0x340   : > { %v2423_v44 = vpack.c.bf16 %v1603_v43, %v1600_v33 }
 0x342   : > { %2463 = vst [vmem:[%s3273_s27 + $0xe8] sm:$0xff] %v2423_v44  }
 0x343   : > { %v1607_v45 = vpop.f32.mrb[112].mxu1 }
 0x344   : > { %v1609_v3 = vpop.f32.mrb[113].mxu1  ;;  %v1608_v47 = vadd.f32 %v3263_v55, %v1607_v45 }
 0x345   : > { %v1610_v46 = vpop.f32.mrb[114].mxu1 }
 0x346   : > { %v1611_v48 = vadd.f32 %v3263_v55, %v1610_v46  ;;  %v1612_v49 = vpop.f32.mrb[115].mxu1 }
 0x348   : > { %v2428_v50 = vpack.c.bf16 %v1611_v48, %v1608_v47 }
 0x34a   : > { %2464 = vst [vmem:[%s3273_s27 + $0xf0] sm:$0xff] %v2428_v50  }
 0x34b   : > { %v1615_v51 = vpop.f32.mrb[116].mxu1 }
 0x34c   : > { %v1617_v52 = vpop.f32.mrb[117].mxu1  ;;  %v1616_v54 = vadd.f32 %v3263_v55, %v1615_v51  ;;  %1949 = sbr.rel (!%p3457_p9) target bundleno = 879 (0x36f), region = 56 }
 0x34d   : > { %v1618_v53 = vpop.f32.mrb[118].mxu1 }
 0x34e   : > { %v1619_v32 = vadd.f32 %v3263_v55, %v1618_v53  ;;  %v1620_v56 = vpop.f32.mrb[119].mxu1 }
 0x350   : > { %v2433_v57 = vpack.c.bf16 %v1619_v32, %v1616_v54 }
 0x352   : > { %2465 = vst [vmem:[%s3273_s27 + $0xf8] sm:$0xff] %v2433_v57  }
 0x353   : > { %s3467_s12 = smov (!%p1952_p10, %s1951_s12), 64 }
 0x354   : > { %s3377_s25 = sshll.u32 %s3467_s12, 6 }
 0x355   : > { %s1956_s28 = ssub.s32 4096, %s3377_s25 }
 0x356   : > { %1957 = vsyncadd %s1943_s8, %s1956_s28  ;;  %p2203_p1 = scmp.ne.s32.totalorder %s3377_s25, 0  ;;  %s2274_s30 = sshll.u32 %s2859_s22, 12 }
 0x357   : > { %s3387_s11 = scalar_lea.hbm %s3441_s5, %s2274_s30  ;;  %s1962_s14 = sshll.u32 %s3273_s27, 4  ;;  %s3390_s14 = int_to_ptr.vmem [resolvable:$true] %s1962_s14 }
 0x358   : > { %s2723_s15 = scalar_lea.vmem %s3390_s14, %s3377_s25  ;;  %s2805_s16 = smov [#allocation8]  }
 0x359   : > { %p2724_p3 = scmp.ne.s32.totalorder %s3390_s14, %s2723_s15  ;;  %s2727_s29 = sshll.u32 %s2805_s16, 4  ;;  %s2728_s29 = int_to_ptr.vmem [resolvable:$false] %s2727_s29 }
 0x35a   : > { %s2729_s22 = scalar_lea.vmem %s2728_s29, 8192  ;;  %p2730_p11 = scmp.lt.s32.totalorder %s3390_s14, %s2728_s29 }
 0x35b   : > { %p2725_p5 = pnand %p2724_p3, %p2203_p1  ;;  %p2731_p13 = scmp.lt.s32.totalorder %s2729_s22, %s2723_s15 }
 0x35d   : > { %p2726_p6 = pneg %p2725_p5  ;;  %p2732_p0 = por %p2731_p13, %p2730_p11 }
 0x35f   : > { %p2733_p12 = pnand %p2732_p0, %p2726_p6 }
 0x361   : > { %2736 = shalt.err (!%p2733_p12)
}
 0x362   : > { %s2737_s7 = scalar_lea.hbm %s3387_s11, %s3377_s25  ;;  %s2741_s27 = scalar_lea.hbm %s3441_s5, 5120 }
 0x363   : > { %p2738_p7 = scmp.ne.s32.totalorder %s3387_s11, %s2737_s7  ;;  %p2742_p9 = scmp.lt.u32.totalorder %s3387_s11, %s3441_s5 }
 0x364   : > { %p2743_p10 = scmp.lt.u32.totalorder %s2741_s27, %s2737_s7  ;;  %p2745_p5 = scmp.lt.u32.totalorder %s2737_s7, %s3387_s11 }
 0x365   : > { %p2739_p2 = pnand %p2738_p7, %p2203_p1 }
 0x366   : > { %p2744_p3 = por %p2743_p10, %p2742_p9 }
 0x367   : > { %p2740_p8 = pneg %p2739_p2 }
 0x368   : > { %p2746_p6 = por %p2745_p5, %p2744_p3 }
 0x36a   : > { %p2747_p11 = pnand %p2746_p6, %p2740_p8 }
 0x36c   : > { %2750 = shalt.err (!%p2747_p11)
}
 0x36d   : > { %s2806_s28 = smov 64   ;;  %s2807_s30 = smov 4  }
 0x36e   : > { %1968 = dma.vmem_to_hbm [thread:$0]  (%p2203_p1), %s3390_s14, %s3377_s25, %s3387_s11, %s1943_s8, %s2806_s28, %s2806_s28, %s2807_s30  }
 0x36f PF: > { %s1977_s26 = sand.u32 1, %s2781_s18   ;;  %p3458_p13 = scmp.ne.s32.totalorder %s3449_s6, 0 }
 0x370   : > { %s1978_s9 = scalar_lea.sflag [#allocation4], %s1977_s26 }
 0x371   : > { %p2516_p0 = pnand %p2058_p4, %p3458_p13 }
 0x373   : > { %2776 = dma.done.wait (!%p2516_p0), %s1978_s9, 4096  }
 0x374   : > { %2778 = vsyncadd (!%p2516_p0), %s1978_s9, 4294963200  ;;  %s3459_s15 = sld [smem:[#allocation12_spill]]  ;;  %p19_p12 = scmp.ge.s32.totalorder %s2863_s24, 4  }
 0x375   : > { %s3460_s18 = smov %s2785_s19  ;;  %s3461_s19 = smov %s2789_s20 }
 0x376   : > { %s3463_s21 = smov %s2863_s24  ;;  %21 = sbr.rel (!%p19_p12) target bundleno = 6 (0x6), region = 93 }
 0x37a   : > { %s3462_s20 = smov %s3459_s15 }
 0x37d   :  { %1983 = vsyncpa [#allocation3], 1 }
 0x37e   :  { %1985 = vsyncpa [#allocation3 + $0x1], 1 }
 0x37f   :  { %1986 = vsyncpa [#allocation6], 1 }
 0x380   :  { %1987 = vsyncpa [#allocation4], 1 }
 0x381   :  { %1989 = vsyncpa [#allocation4 + $0x1], 1 }

</bundles_post_ra>
